<compile_context>
chip_gen: v7x
topology: tpu7x:2x2x1
jax: 0.10.0
libtpu: 0.0.40
codegen_flags: <defaults>
</compile_context>

<pallas_src>
import jax
import jax.numpy as jnp
from jax.experimental import pallas as pl
from jax.experimental.pallas import tpu as pltpu
import numpy as np


def _round_up(a, m):
    return (a + m - 1) // m * m


def hedger_kernel(w_ref, v_ref, b_ref, s0_ref, x_ref, hedge_ref, spots_ref):
    # SMEM scalar params:
    #   w_ref, v_ref : (n_dim, n_dim) f32    delta-network weights
    #   b_ref        : (n_dim,)       f32    delta-network bias
    #   s0_ref       : (n_dim,)       f32    model initial value
    # VMEM tensors (2-D, samples on the 128-wide lane axis; row r = step * n_dim + dim):
    #   x_ref     : (n_steps * n_dim,                      ts)
    #   hedge_ref : (n_steps * n_dim,                      ts)
    #   spots_ref : (round_up((n_steps + 1) * n_dim, 8),   ts)   (pad rows sliced off later)
    n_dim = w_ref.shape[0]
    ts = x_ref.shape[-1]
    n_steps = x_ref.shape[0] // n_dim
    rows_spots = spots_ref.shape[0]

    # ---- hoist every SMEM scalar read + broadcast out of the step loop (done ONCE) ----
    # Columns of W / V as (n_dim, 1) values so each contraction index k is a single
    # (n_dim, ts) broadcast-FMA:  acc += W[k, :, None] * spot[k:k+1, :]   (VPU, no MXU).
    w_cols = [
        jnp.concatenate(
            [jnp.full((1, 1), w_ref[k, j], dtype=jnp.float32) for j in range(n_dim)],
            axis=0)
        for k in range(n_dim)
    ]
    v_cols = [
        jnp.concatenate(
            [jnp.full((1, 1), v_ref[k, j], dtype=jnp.float32) for j in range(n_dim)],
            axis=0)
        for k in range(n_dim)
    ]
    b_slab = jnp.concatenate(
        [jnp.full((1, ts), b_ref[j], dtype=jnp.float32) for j in range(n_dim)], axis=0)
    spot = jnp.concatenate(
        [jnp.full((1, ts), s0_ref[d], dtype=jnp.float32) for d in range(n_dim)], axis=0)

    # Steps are processed in chunks so hedge/spots stores cover full 8-sublane groups
    # (chunk * n_dim == 8 when n_dim divides 8 -> unmasked vst).
    chunk = 8 // n_dim if (0 < n_dim <= 8 and 8 % n_dim == 0) else 1
    if n_steps % chunk != 0:
        chunk = 1

    h_prev = None  # step 0: prev_hedge == 0, so the V-term is skipped
    for c in range(n_steps // chunk):
        base = c * chunk * n_dim
        # One EUP pass over the whole chunk's increments (8 sublanes x ts lanes).
        ex = jnp.exp(x_ref[base:base + chunk * n_dim, :])
        spot_rows = []
        hedge_rows = []
        for s in range(chunk):
            # ZeroImpact: impacted price recorded for this step == current spot.
            spot_rows.append(spot)
            # delta: h = tanh(spot @ W + prev_hedge @ V + b) as (n_dim, ts) slab FMAs.
            acc = b_slab
            for k in range(n_dim):
                acc = acc + w_cols[k] * spot[k:k + 1, :]
            if h_prev is not None:
                for k in range(n_dim):
                    acc = acc + v_cols[k] * h_prev[k:k + 1, :]
            h = jnp.tanh(acc)
            hedge_rows.append(h)
            h_prev = h
            # model.simulate: spot_{i+1} = spot_i * exp(x_i)
            spot = spot * ex[s * n_dim:(s + 1) * n_dim, :]
        # 8-row-aligned slab stores; only this chunk's rows were kept live.
        hedge_ref[base:base + chunk * n_dim, :] = jnp.concatenate(hedge_rows, axis=0)
        spots_ref[base:base + chunk * n_dim, :] = jnp.concatenate(spot_rows, axis=0)

    # Trailing unwind slot (step n_steps) plus pad rows, written as one aligned store.
    tail_rows = rows_spots - n_steps * n_dim
    tail = spot
    if tail_rows > n_dim:
        tail = jnp.concatenate(
            [spot, jnp.zeros((tail_rows - n_dim, ts), jnp.float32)], axis=0)
    spots_ref[n_steps * n_dim:rows_spots, :] = tail


def base_hedger_forward(x, initial_value, W, V, b, *, tile_samples=2048):
    """x: (n_samples, n_dim, n_steps) float32 -> (hedge, spots, costs) in PyTorch layout."""
    n_samples, n_dim, n_steps = x.shape

    # Samples go on the 128-wide lane axis; clamp the tile to the (padded) batch so
    # small batches don't over-pad.  For v7x keep the resulting grid >= 2 when possible.
    ts = max(128, min(_round_up(tile_samples, 128), _round_up(n_samples, 128)))

    # Kernel layout: (step, dim, sample) flattened to 2-D (lane-dense).
    # NOTE: these transposes are extra HBM passes; downstream code that can consume the
    # (step*dim, sample) layout directly should skip them.
    xk = jnp.transpose(x.astype(jnp.float32), (2, 1, 0)).reshape(n_steps * n_dim, n_samples)
    n_pad = _round_up(n_samples, ts)
    if n_pad != n_samples:
        xk = jnp.pad(xk, ((0, 0), (0, n_pad - n_samples)))

    rows_h = n_steps * n_dim
    rows_s = _round_up((n_steps + 1) * n_dim, 8)   # pad so every store is 8-row aligned

    W32 = jnp.asarray(W, jnp.float32).reshape(n_dim, n_dim)
    V32 = jnp.asarray(V, jnp.float32).reshape(n_dim, n_dim)
    b32 = jnp.asarray(b, jnp.float32).reshape(n_dim)
    s032 = jnp.asarray(initial_value, jnp.float32).reshape(n_dim)

    grid = (n_pad // ts,)
    hedge_k, spots_k = pl.pallas_call(
        hedger_kernel,
        out_shape=(
            jax.ShapeDtypeStruct((rows_h, n_pad), jnp.float32),
            jax.ShapeDtypeStruct((rows_s, n_pad), jnp.float32),
        ),
        grid_spec=pltpu.PrefetchScalarGridSpec(
            num_scalar_prefetch=0,
            grid=grid,
            in_specs=[
                pl.BlockSpec(memory_space=pltpu.MemorySpace.SMEM),   # W
                pl.BlockSpec(memory_space=pltpu.MemorySpace.SMEM),   # V
                pl.BlockSpec(memory_space=pltpu.MemorySpace.SMEM),   # b
                pl.BlockSpec(memory_space=pltpu.MemorySpace.SMEM),   # initial value
                pl.BlockSpec((rows_h, ts), lambda s: (0, s)),        # x
            ],
            out_specs=[
                pl.BlockSpec((rows_h, ts), lambda s: (0, s)),        # hedge
                pl.BlockSpec((rows_s, ts), lambda s: (0, s)),        # spots (row-padded)
            ],
        ),
        compiler_params=pltpu.CompilerParams(
            dimension_semantics=("parallel",),
        ),
    )(W32, V32, b32, s032, xk)

    # Back to PyTorch layout (n_samples, n_dim, n_steps[+1]); slice off sample/row pads.
    hedge = jnp.transpose(
        hedge_k[:, :n_samples].reshape(n_steps, n_dim, n_samples), (2, 1, 0))
    spots = jnp.transpose(
        spots_k[:(n_steps + 1) * n_dim, :n_samples].reshape(n_steps + 1, n_dim, n_samples),
        (2, 1, 0))
    # ZeroCost -> costs is identically zero; no need to produce it in the kernel.
    costs = jnp.zeros((n_samples, n_dim, n_steps + 1), jnp.float32)
    return hedge, spots, costs


def base_hedger_reference(x, initial_value, W, V, b):
    """Pure-numpy reference mirroring the PyTorch loop (for correctness check)."""
    n_samples, n_dim, n_steps = x.shape
    hedge = np.zeros((n_samples, n_dim, n_steps), np.float32)
    spots = np.zeros((n_samples, n_dim, n_steps + 1), np.float32)
    costs = np.zeros((n_samples, n_dim, n_steps + 1), np.float32)
    xn = np.asarray(x)
    Wn, Vn, bn = np.asarray(W), np.asarray(V), np.asarray(b)
    prev = np.zeros((n_samples, n_dim), np.float32)
    spot = np.broadcast_to(np.asarray(initial_value), (n_samples, n_dim)).astype(np.float32).copy()
    for i in range(n_steps):
        h = np.tanh(spot @ Wn + prev @ Vn + bn)
        hedge[:, :, i] = h
        spots[:, :, i] = spot            # ZeroImpact
        costs[:, :, i] = 0.0             # ZeroCost
        spot = spot * np.exp(xn[:, :, i])
        prev = h
    spots[:, :, n_steps] = spot
    costs[:, :, n_steps] = 0.0
    return hedge, spots, costs


if __name__ == "__main__":
    n_samples, n_dim, n_steps = 512, 4, 8
    tile_samples = 256                  # grid = 2 -> exercises the grid loop / both v7x TCs

    key = jax.random.PRNGKey(0)
    kx, kw, kv, kb = jax.random.split(key, 4)

    # log-return increments (small so exp() stays tame)
    x = (0.05 * jax.random.normal(kx, (n_samples, n_dim, n_steps))).astype(jnp.float32)

    # deterministic synthetic parameters (state of size n_dim, as the module implies)
    initial_value = jnp.full((n_dim,), 1.0, dtype=jnp.float32)     # model.initial_value
    W = (0.5 * jax.random.normal(kw, (n_dim, n_dim))).astype(jnp.float32)
    V = (0.5 * jax.random.normal(kv, (n_dim, n_dim))).astype(jnp.float32)
    b = (0.1 * jax.random.normal(kb, (n_dim,))).astype(jnp.float32)

    hedge, spots, costs = base_hedger_forward(
        x, initial_value, W, V, b, tile_samples=tile_samples)
    jax.block_until_ready((hedge, spots, costs))

    h_ref, s_ref, c_ref = base_hedger_reference(x, initial_value, W, V, b)
    assert hedge.shape == (n_samples, n_dim, n_steps)
    assert spots.shape == (n_samples, n_dim, n_steps + 1)
    assert costs.shape == (n_samples, n_dim, n_steps + 1)
    np.testing.assert_allclose(np.asarray(hedge), h_ref, atol=1e-5, rtol=1e-5)
    np.testing.assert_allclose(np.asarray(spots), s_ref, atol=1e-5, rtol=1e-5)
    np.testing.assert_allclose(np.asarray(costs), c_ref, atol=1e-5, rtol=1e-5)

    print("KERNEL_OK")
</pallas_src>

<mosaic_0001>
module attributes {stable_mosaic.version = 11 : i64} {
  func.func @hedger_kernel(%arg0: i32, %arg1: memref<4x4xf32, #tpu.memory_space<smem>>, %arg2: memref<4x4xf32, #tpu.memory_space<smem>>, %arg3: memref<4xf32, #tpu.memory_space<smem>>, %arg4: memref<4xf32, #tpu.memory_space<smem>>, %arg5: memref<32x256xf32, #tpu.memory_space<vmem>>, %arg6: memref<32x256xf32, #tpu.memory_space<vmem>>, %arg7: memref<40x256xf32, #tpu.memory_space<vmem>>) attributes {dimension_semantics = [#tpu.dimension_semantics<parallel>], iteration_bounds = array<i64: 2>, scalar_prefetch = 0 : i64, scratch_operands = 0 : i64, tpu.core_type = #tpu.core_type<tc>, window_params = [{transform_indices = @transform_0, window_bounds = array<i64: 4, 4>}, {transform_indices = @transform_1, window_bounds = array<i64: 4, 4>}, {transform_indices = @transform_2, window_bounds = array<i64: 4>}, {transform_indices = @transform_3, window_bounds = array<i64: 4>}, {transform_indices = @transform_4, window_bounds = array<i64: 32, 256>}, {transform_indices = @transform_5, window_bounds = array<i64: 32, 256>}, {transform_indices = @transform_6, window_bounds = array<i64: 40, 256>}]} {
    %c0 = arith.constant 0 : index
    %c0_0 = arith.constant 0 : index
    %0 = memref.load %arg1[%c0, %c0_0] : memref<4x4xf32, #tpu.memory_space<smem>>
    %1 = vector.broadcast %0 : f32 to vector<1x1xf32>
    %c0_1 = arith.constant 0 : index
    %c1 = arith.constant 1 : index
    %2 = memref.load %arg1[%c0_1, %c1] : memref<4x4xf32, #tpu.memory_space<smem>>
    %3 = vector.broadcast %2 : f32 to vector<1x1xf32>
    %c0_2 = arith.constant 0 : index
    %c2 = arith.constant 2 : index
    %4 = memref.load %arg1[%c0_2, %c2] : memref<4x4xf32, #tpu.memory_space<smem>>
    %5 = vector.broadcast %4 : f32 to vector<1x1xf32>
    %c0_3 = arith.constant 0 : index
    %c3 = arith.constant 3 : index
    %6 = memref.load %arg1[%c0_3, %c3] : memref<4x4xf32, #tpu.memory_space<smem>>
    %7 = vector.broadcast %6 : f32 to vector<1x1xf32>
    %8 = tpu.concatenate %1, %3, %5, %7 in 0 : vector<1x1xf32>, vector<1x1xf32>, vector<1x1xf32>, vector<1x1xf32> -> vector<4x1xf32>
    %c1_4 = arith.constant 1 : index
    %c0_5 = arith.constant 0 : index
    %9 = memref.load %arg1[%c1_4, %c0_5] : memref<4x4xf32, #tpu.memory_space<smem>>
    %10 = vector.broadcast %9 : f32 to vector<1x1xf32>
    %c1_6 = arith.constant 1 : index
    %c1_7 = arith.constant 1 : index
    %11 = memref.load %arg1[%c1_6, %c1_7] : memref<4x4xf32, #tpu.memory_space<smem>>
    %12 = vector.broadcast %11 : f32 to vector<1x1xf32>
    %c1_8 = arith.constant 1 : index
    %c2_9 = arith.constant 2 : index
    %13 = memref.load %arg1[%c1_8, %c2_9] : memref<4x4xf32, #tpu.memory_space<smem>>
    %14 = vector.broadcast %13 : f32 to vector<1x1xf32>
    %c1_10 = arith.constant 1 : index
    %c3_11 = arith.constant 3 : index
    %15 = memref.load %arg1[%c1_10, %c3_11] : memref<4x4xf32, #tpu.memory_space<smem>>
    %16 = vector.broadcast %15 : f32 to vector<1x1xf32>
    %17 = tpu.concatenate %10, %12, %14, %16 in 0 : vector<1x1xf32>, vector<1x1xf32>, vector<1x1xf32>, vector<1x1xf32> -> vector<4x1xf32>
    %c2_12 = arith.constant 2 : index
    %c0_13 = arith.constant 0 : index
    %18 = memref.load %arg1[%c2_12, %c0_13] : memref<4x4xf32, #tpu.memory_space<smem>>
    %19 = vector.broadcast %18 : f32 to vector<1x1xf32>
    %c2_14 = arith.constant 2 : index
    %c1_15 = arith.constant 1 : index
    %20 = memref.load %arg1[%c2_14, %c1_15] : memref<4x4xf32, #tpu.memory_space<smem>>
    %21 = vector.broadcast %20 : f32 to vector<1x1xf32>
    %c2_16 = arith.constant 2 : index
    %c2_17 = arith.constant 2 : index
    %22 = memref.load %arg1[%c2_16, %c2_17] : memref<4x4xf32, #tpu.memory_space<smem>>
    %23 = vector.broadcast %22 : f32 to vector<1x1xf32>
    %c2_18 = arith.constant 2 : index
    %c3_19 = arith.constant 3 : index
    %24 = memref.load %arg1[%c2_18, %c3_19] : memref<4x4xf32, #tpu.memory_space<smem>>
    %25 = vector.broadcast %24 : f32 to vector<1x1xf32>
    %26 = tpu.concatenate %19, %21, %23, %25 in 0 : vector<1x1xf32>, vector<1x1xf32>, vector<1x1xf32>, vector<1x1xf32> -> vector<4x1xf32>
    %c3_20 = arith.constant 3 : index
    %c0_21 = arith.constant 0 : index
    %27 = memref.load %arg1[%c3_20, %c0_21] : memref<4x4xf32, #tpu.memory_space<smem>>
    %28 = vector.broadcast %27 : f32 to vector<1x1xf32>
    %c3_22 = arith.constant 3 : index
    %c1_23 = arith.constant 1 : index
    %29 = memref.load %arg1[%c3_22, %c1_23] : memref<4x4xf32, #tpu.memory_space<smem>>
    %30 = vector.broadcast %29 : f32 to vector<1x1xf32>
    %c3_24 = arith.constant 3 : index
    %c2_25 = arith.constant 2 : index
    %31 = memref.load %arg1[%c3_24, %c2_25] : memref<4x4xf32, #tpu.memory_space<smem>>
    %32 = vector.broadcast %31 : f32 to vector<1x1xf32>
    %c3_26 = arith.constant 3 : index
    %c3_27 = arith.constant 3 : index
    %33 = memref.load %arg1[%c3_26, %c3_27] : memref<4x4xf32, #tpu.memory_space<smem>>
    %34 = vector.broadcast %33 : f32 to vector<1x1xf32>
    %35 = tpu.concatenate %28, %30, %32, %34 in 0 : vector<1x1xf32>, vector<1x1xf32>, vector<1x1xf32>, vector<1x1xf32> -> vector<4x1xf32>
    %c0_28 = arith.constant 0 : index
    %c0_29 = arith.constant 0 : index
    %36 = memref.load %arg2[%c0_28, %c0_29] : memref<4x4xf32, #tpu.memory_space<smem>>
    %37 = vector.broadcast %36 : f32 to vector<1x1xf32>
    %c0_30 = arith.constant 0 : index
    %c1_31 = arith.constant 1 : index
    %38 = memref.load %arg2[%c0_30, %c1_31] : memref<4x4xf32, #tpu.memory_space<smem>>
    %39 = vector.broadcast %38 : f32 to vector<1x1xf32>
    %c0_32 = arith.constant 0 : index
    %c2_33 = arith.constant 2 : index
    %40 = memref.load %arg2[%c0_32, %c2_33] : memref<4x4xf32, #tpu.memory_space<smem>>
    %41 = vector.broadcast %40 : f32 to vector<1x1xf32>
    %c0_34 = arith.constant 0 : index
    %c3_35 = arith.constant 3 : index
    %42 = memref.load %arg2[%c0_34, %c3_35] : memref<4x4xf32, #tpu.memory_space<smem>>
    %43 = vector.broadcast %42 : f32 to vector<1x1xf32>
    %44 = tpu.concatenate %37, %39, %41, %43 in 0 : vector<1x1xf32>, vector<1x1xf32>, vector<1x1xf32>, vector<1x1xf32> -> vector<4x1xf32>
    %c1_36 = arith.constant 1 : index
    %c0_37 = arith.constant 0 : index
    %45 = memref.load %arg2[%c1_36, %c0_37] : memref<4x4xf32, #tpu.memory_space<smem>>
    %46 = vector.broadcast %45 : f32 to vector<1x1xf32>
    %c1_38 = arith.constant 1 : index
    %c1_39 = arith.constant 1 : index
    %47 = memref.load %arg2[%c1_38, %c1_39] : memref<4x4xf32, #tpu.memory_space<smem>>
    %48 = vector.broadcast %47 : f32 to vector<1x1xf32>
    %c1_40 = arith.constant 1 : index
    %c2_41 = arith.constant 2 : index
    %49 = memref.load %arg2[%c1_40, %c2_41] : memref<4x4xf32, #tpu.memory_space<smem>>
    %50 = vector.broadcast %49 : f32 to vector<1x1xf32>
    %c1_42 = arith.constant 1 : index
    %c3_43 = arith.constant 3 : index
    %51 = memref.load %arg2[%c1_42, %c3_43] : memref<4x4xf32, #tpu.memory_space<smem>>
    %52 = vector.broadcast %51 : f32 to vector<1x1xf32>
    %53 = tpu.concatenate %46, %48, %50, %52 in 0 : vector<1x1xf32>, vector<1x1xf32>, vector<1x1xf32>, vector<1x1xf32> -> vector<4x1xf32>
    %c2_44 = arith.constant 2 : index
    %c0_45 = arith.constant 0 : index
    %54 = memref.load %arg2[%c2_44, %c0_45] : memref<4x4xf32, #tpu.memory_space<smem>>
    %55 = vector.broadcast %54 : f32 to vector<1x1xf32>
    %c2_46 = arith.constant 2 : index
    %c1_47 = arith.constant 1 : index
    %56 = memref.load %arg2[%c2_46, %c1_47] : memref<4x4xf32, #tpu.memory_space<smem>>
    %57 = vector.broadcast %56 : f32 to vector<1x1xf32>
    %c2_48 = arith.constant 2 : index
    %c2_49 = arith.constant 2 : index
    %58 = memref.load %arg2[%c2_48, %c2_49] : memref<4x4xf32, #tpu.memory_space<smem>>
    %59 = vector.broadcast %58 : f32 to vector<1x1xf32>
    %c2_50 = arith.constant 2 : index
    %c3_51 = arith.constant 3 : index
    %60 = memref.load %arg2[%c2_50, %c3_51] : memref<4x4xf32, #tpu.memory_space<smem>>
    %61 = vector.broadcast %60 : f32 to vector<1x1xf32>
    %62 = tpu.concatenate %55, %57, %59, %61 in 0 : vector<1x1xf32>, vector<1x1xf32>, vector<1x1xf32>, vector<1x1xf32> -> vector<4x1xf32>
    %c3_52 = arith.constant 3 : index
    %c0_53 = arith.constant 0 : index
    %63 = memref.load %arg2[%c3_52, %c0_53] : memref<4x4xf32, #tpu.memory_space<smem>>
    %64 = vector.broadcast %63 : f32 to vector<1x1xf32>
    %c3_54 = arith.constant 3 : index
    %c1_55 = arith.constant 1 : index
    %65 = memref.load %arg2[%c3_54, %c1_55] : memref<4x4xf32, #tpu.memory_space<smem>>
    %66 = vector.broadcast %65 : f32 to vector<1x1xf32>
    %c3_56 = arith.constant 3 : index
    %c2_57 = arith.constant 2 : index
    %67 = memref.load %arg2[%c3_56, %c2_57] : memref<4x4xf32, #tpu.memory_space<smem>>
    %68 = vector.broadcast %67 : f32 to vector<1x1xf32>
    %c3_58 = arith.constant 3 : index
    %c3_59 = arith.constant 3 : index
    %69 = memref.load %arg2[%c3_58, %c3_59] : memref<4x4xf32, #tpu.memory_space<smem>>
    %70 = vector.broadcast %69 : f32 to vector<1x1xf32>
    %71 = tpu.concatenate %64, %66, %68, %70 in 0 : vector<1x1xf32>, vector<1x1xf32>, vector<1x1xf32>, vector<1x1xf32> -> vector<4x1xf32>
    %c0_60 = arith.constant 0 : index
    %72 = memref.load %arg3[%c0_60] : memref<4xf32, #tpu.memory_space<smem>>
    %73 = vector.broadcast %72 : f32 to vector<1x256xf32>
    %c1_61 = arith.constant 1 : index
    %74 = memref.load %arg3[%c1_61] : memref<4xf32, #tpu.memory_space<smem>>
    %75 = vector.broadcast %74 : f32 to vector<1x256xf32>
    %c2_62 = arith.constant 2 : index
    %76 = memref.load %arg3[%c2_62] : memref<4xf32, #tpu.memory_space<smem>>
    %77 = vector.broadcast %76 : f32 to vector<1x256xf32>
    %c3_63 = arith.constant 3 : index
    %78 = memref.load %arg3[%c3_63] : memref<4xf32, #tpu.memory_space<smem>>
    %79 = vector.broadcast %78 : f32 to vector<1x256xf32>
    %80 = tpu.concatenate %73, %75, %77, %79 in 0 : vector<1x256xf32>, vector<1x256xf32>, vector<1x256xf32>, vector<1x256xf32> -> vector<4x256xf32>
    %c0_64 = arith.constant 0 : index
    %81 = memref.load %arg4[%c0_64] : memref<4xf32, #tpu.memory_space<smem>>
    %82 = vector.broadcast %81 : f32 to vector<1x256xf32>
    %c1_65 = arith.constant 1 : index
    %83 = memref.load %arg4[%c1_65] : memref<4xf32, #tpu.memory_space<smem>>
    %84 = vector.broadcast %83 : f32 to vector<1x256xf32>
    %c2_66 = arith.constant 2 : index
    %85 = memref.load %arg4[%c2_66] : memref<4xf32, #tpu.memory_space<smem>>
    %86 = vector.broadcast %85 : f32 to vector<1x256xf32>
    %c3_67 = arith.constant 3 : index
    %87 = memref.load %arg4[%c3_67] : memref<4xf32, #tpu.memory_space<smem>>
    %88 = vector.broadcast %87 : f32 to vector<1x256xf32>
    %89 = tpu.concatenate %82, %84, %86, %88 in 0 : vector<1x256xf32>, vector<1x256xf32>, vector<1x256xf32>, vector<1x256xf32> -> vector<4x256xf32>
    %c0_68 = arith.constant 0 : index
    %c0_69 = arith.constant 0 : index
    %90 = vector.load %arg5[%c0_68, %c0_69] : memref<32x256xf32, #tpu.memory_space<vmem>>, vector<8x256xf32>
    %91 = math.exp %90 : vector<8x256xf32>
    %92 = vector.extract_strided_slice %89 {offsets = [0, 0], sizes = [1, 256], strides = [1, 1]} : vector<4x256xf32> to vector<1x256xf32>
    %93 = vector.broadcast %8 : vector<4x1xf32> to vector<4x256xf32>
    %94 = vector.broadcast %92 : vector<1x256xf32> to vector<4x256xf32>
    %95 = arith.mulf %93, %94 : vector<4x256xf32>
    %96 = arith.addf %80, %95 : vector<4x256xf32>
    %97 = vector.extract_strided_slice %89 {offsets = [1, 0], sizes = [1, 256], strides = [1, 1]} : vector<4x256xf32> to vector<1x256xf32>
    %98 = vector.broadcast %17 : vector<4x1xf32> to vector<4x256xf32>
    %99 = vector.broadcast %97 : vector<1x256xf32> to vector<4x256xf32>
    %100 = arith.mulf %98, %99 : vector<4x256xf32>
    %101 = arith.addf %96, %100 : vector<4x256xf32>
    %102 = vector.extract_strided_slice %89 {offsets = [2, 0], sizes = [1, 256], strides = [1, 1]} : vector<4x256xf32> to vector<1x256xf32>
    %103 = vector.broadcast %26 : vector<4x1xf32> to vector<4x256xf32>
    %104 = vector.broadcast %102 : vector<1x256xf32> to vector<4x256xf32>
    %105 = arith.mulf %103, %104 : vector<4x256xf32>
    %106 = arith.addf %101, %105 : vector<4x256xf32>
    %107 = vector.extract_strided_slice %89 {offsets = [3, 0], sizes = [1, 256], strides = [1, 1]} : vector<4x256xf32> to vector<1x256xf32>
    %108 = vector.broadcast %35 : vector<4x1xf32> to vector<4x256xf32>
    %109 = vector.broadcast %107 : vector<1x256xf32> to vector<4x256xf32>
    %110 = arith.mulf %108, %109 : vector<4x256xf32>
    %111 = arith.addf %106, %110 : vector<4x256xf32>
    %112 = math.tanh %111 : vector<4x256xf32>
    %113 = vector.extract_strided_slice %91 {offsets = [0, 0], sizes = [4, 256], strides = [1, 1]} : vector<8x256xf32> to vector<4x256xf32>
    %114 = arith.mulf %89, %113 : vector<4x256xf32>
    %115 = vector.extract_strided_slice %114 {offsets = [0, 0], sizes = [1, 256], strides = [1, 1]} : vector<4x256xf32> to vector<1x256xf32>
    %116 = vector.broadcast %8 : vector<4x1xf32> to vector<4x256xf32>
    %117 = vector.broadcast %115 : vector<1x256xf32> to vector<4x256xf32>
    %118 = arith.mulf %116, %117 : vector<4x256xf32>
    %119 = arith.addf %80, %118 : vector<4x256xf32>
    %120 = vector.extract_strided_slice %114 {offsets = [1, 0], sizes = [1, 256], strides = [1, 1]} : vector<4x256xf32> to vector<1x256xf32>
    %121 = vector.broadcast %17 : vector<4x1xf32> to vector<4x256xf32>
    %122 = vector.broadcast %120 : vector<1x256xf32> to vector<4x256xf32>
    %123 = arith.mulf %121, %122 : vector<4x256xf32>
    %124 = arith.addf %119, %123 : vector<4x256xf32>
    %125 = vector.extract_strided_slice %114 {offsets = [2, 0], sizes = [1, 256], strides = [1, 1]} : vector<4x256xf32> to vector<1x256xf32>
    %126 = vector.broadcast %26 : vector<4x1xf32> to vector<4x256xf32>
    %127 = vector.broadcast %125 : vector<1x256xf32> to vector<4x256xf32>
    %128 = arith.mulf %126, %127 : vector<4x256xf32>
    %129 = arith.addf %124, %128 : vector<4x256xf32>
    %130 = vector.extract_strided_slice %114 {offsets = [3, 0], sizes = [1, 256], strides = [1, 1]} : vector<4x256xf32> to vector<1x256xf32>
    %131 = vector.broadcast %35 : vector<4x1xf32> to vector<4x256xf32>
    %132 = vector.broadcast %130 : vector<1x256xf32> to vector<4x256xf32>
    %133 = arith.mulf %131, %132 : vector<4x256xf32>
    %134 = arith.addf %129, %133 : vector<4x256xf32>
    %135 = vector.extract_strided_slice %112 {offsets = [0, 0], sizes = [1, 256], strides = [1, 1]} : vector<4x256xf32> to vector<1x256xf32>
    %136 = vector.broadcast %44 : vector<4x1xf32> to vector<4x256xf32>
    %137 = vector.broadcast %135 : vector<1x256xf32> to vector<4x256xf32>
    %138 = arith.mulf %136, %137 : vector<4x256xf32>
    %139 = arith.addf %134, %138 : vector<4x256xf32>
    %140 = vector.extract_strided_slice %112 {offsets = [1, 0], sizes = [1, 256], strides = [1, 1]} : vector<4x256xf32> to vector<1x256xf32>
    %141 = vector.broadcast %53 : vector<4x1xf32> to vector<4x256xf32>
    %142 = vector.broadcast %140 : vector<1x256xf32> to vector<4x256xf32>
    %143 = arith.mulf %141, %142 : vector<4x256xf32>
    %144 = arith.addf %139, %143 : vector<4x256xf32>
    %145 = vector.extract_strided_slice %112 {offsets = [2, 0], sizes = [1, 256], strides = [1, 1]} : vector<4x256xf32> to vector<1x256xf32>
    %146 = vector.broadcast %62 : vector<4x1xf32> to vector<4x256xf32>
    %147 = vector.broadcast %145 : vector<1x256xf32> to vector<4x256xf32>
    %148 = arith.mulf %146, %147 : vector<4x256xf32>
    %149 = arith.addf %144, %148 : vector<4x256xf32>
    %150 = vector.extract_strided_slice %112 {offsets = [3, 0], sizes = [1, 256], strides = [1, 1]} : vector<4x256xf32> to vector<1x256xf32>
    %151 = vector.broadcast %71 : vector<4x1xf32> to vector<4x256xf32>
    %152 = vector.broadcast %150 : vector<1x256xf32> to vector<4x256xf32>
    %153 = arith.mulf %151, %152 : vector<4x256xf32>
    %154 = arith.addf %149, %153 : vector<4x256xf32>
    %155 = math.tanh %154 : vector<4x256xf32>
    %156 = vector.extract_strided_slice %91 {offsets = [4, 0], sizes = [4, 256], strides = [1, 1]} : vector<8x256xf32> to vector<4x256xf32>
    %157 = arith.mulf %114, %156 : vector<4x256xf32>
    %158 = tpu.concatenate %112, %155 in 0 : vector<4x256xf32>, vector<4x256xf32> -> vector<8x256xf32>
    %c0_70 = arith.constant 0 : index
    %c0_71 = arith.constant 0 : index
    %159 = vector.load %arg6[%c0_70, %c0_71] : memref<32x256xf32, #tpu.memory_space<vmem>>, vector<8x256xf32>
    tpu.vector_store %arg6[%c0_70, %c0_71], %158 {strides = array<i32>} : memref<32x256xf32, #tpu.memory_space<vmem>>, vector<8x256xf32>,
    %160 = tpu.concatenate %89, %114 in 0 : vector<4x256xf32>, vector<4x256xf32> -> vector<8x256xf32>
    %c0_72 = arith.constant 0 : index
    %c0_73 = arith.constant 0 : index
    %161 = vector.load %arg7[%c0_72, %c0_73] : memref<40x256xf32, #tpu.memory_space<vmem>>, vector<8x256xf32>
    tpu.vector_store %arg7[%c0_72, %c0_73], %160 {strides = array<i32>} : memref<40x256xf32, #tpu.memory_space<vmem>>, vector<8x256xf32>,
    %c8 = arith.constant 8 : index
    %c0_74 = arith.constant 0 : index
    %162 = vector.load %arg5[%c8, %c0_74] : memref<32x256xf32, #tpu.memory_space<vmem>>, vector<8x256xf32>
    %163 = math.exp %162 : vector<8x256xf32>
    %164 = vector.extract_strided_slice %157 {offsets = [0, 0], sizes = [1, 256], strides = [1, 1]} : vector<4x256xf32> to vector<1x256xf32>
    %165 = vector.broadcast %8 : vector<4x1xf32> to vector<4x256xf32>
    %166 = vector.broadcast %164 : vector<1x256xf32> to vector<4x256xf32>
    %167 = arith.mulf %165, %166 : vector<4x256xf32>
    %168 = arith.addf %80, %167 : vector<4x256xf32>
    %169 = vector.extract_strided_slice %157 {offsets = [1, 0], sizes = [1, 256], strides = [1, 1]} : vector<4x256xf32> to vector<1x256xf32>
    %170 = vector.broadcast %17 : vector<4x1xf32> to vector<4x256xf32>
    %171 = vector.broadcast %169 : vector<1x256xf32> to vector<4x256xf32>
    %172 = arith.mulf %170, %171 : vector<4x256xf32>
    %173 = arith.addf %168, %172 : vector<4x256xf32>
    %174 = vector.extract_strided_slice %157 {offsets = [2, 0], sizes = [1, 256], strides = [1, 1]} : vector<4x256xf32> to vector<1x256xf32>
    %175 = vector.broadcast %26 : vector<4x1xf32> to vector<4x256xf32>
    %176 = vector.broadcast %174 : vector<1x256xf32> to vector<4x256xf32>
    %177 = arith.mulf %175, %176 : vector<4x256xf32>
    %178 = arith.addf %173, %177 : vector<4x256xf32>
    %179 = vector.extract_strided_slice %157 {offsets = [3, 0], sizes = [1, 256], strides = [1, 1]} : vector<4x256xf32> to vector<1x256xf32>
    %180 = vector.broadcast %35 : vector<4x1xf32> to vector<4x256xf32>
    %181 = vector.broadcast %179 : vector<1x256xf32> to vector<4x256xf32>
    %182 = arith.mulf %180, %181 : vector<4x256xf32>
    %183 = arith.addf %178, %182 : vector<4x256xf32>
    %184 = vector.extract_strided_slice %155 {offsets = [0, 0], sizes = [1, 256], strides = [1, 1]} : vector<4x256xf32> to vector<1x256xf32>
    %185 = vector.broadcast %44 : vector<4x1xf32> to vector<4x256xf32>
    %186 = vector.broadcast %184 : vector<1x256xf32> to vector<4x256xf32>
    %187 = arith.mulf %185, %186 : vector<4x256xf32>
    %188 = arith.addf %183, %187 : vector<4x256xf32>
    %189 = vector.extract_strided_slice %155 {offsets = [1, 0], sizes = [1, 256], strides = [1, 1]} : vector<4x256xf32> to vector<1x256xf32>
    %190 = vector.broadcast %53 : vector<4x1xf32> to vector<4x256xf32>
    %191 = vector.broadcast %189 : vector<1x256xf32> to vector<4x256xf32>
    %192 = arith.mulf %190, %191 : vector<4x256xf32>
    %193 = arith.addf %188, %192 : vector<4x256xf32>
    %194 = vector.extract_strided_slice %155 {offsets = [2, 0], sizes = [1, 256], strides = [1, 1]} : vector<4x256xf32> to vector<1x256xf32>
    %195 = vector.broadcast %62 : vector<4x1xf32> to vector<4x256xf32>
    %196 = vector.broadcast %194 : vector<1x256xf32> to vector<4x256xf32>
    %197 = arith.mulf %195, %196 : vector<4x256xf32>
    %198 = arith.addf %193, %197 : vector<4x256xf32>
    %199 = vector.extract_strided_slice %155 {offsets = [3, 0], sizes = [1, 256], strides = [1, 1]} : vector<4x256xf32> to vector<1x256xf32>
    %200 = vector.broadcast %71 : vector<4x1xf32> to vector<4x256xf32>
    %201 = vector.broadcast %199 : vector<1x256xf32> to vector<4x256xf32>
    %202 = arith.mulf %200, %201 : vector<4x256xf32>
    %203 = arith.addf %198, %202 : vector<4x256xf32>
    %204 = math.tanh %203 : vector<4x256xf32>
    %205 = vector.extract_strided_slice %163 {offsets = [0, 0], sizes = [4, 256], strides = [1, 1]} : vector<8x256xf32> to vector<4x256xf32>
    %206 = arith.mulf %157, %205 : vector<4x256xf32>
    %207 = vector.extract_strided_slice %206 {offsets = [0, 0], sizes = [1, 256], strides = [1, 1]} : vector<4x256xf32> to vector<1x256xf32>
    %208 = vector.broadcast %8 : vector<4x1xf32> to vector<4x256xf32>
    %209 = vector.broadcast %207 : vector<1x256xf32> to vector<4x256xf32>
    %210 = arith.mulf %208, %209 : vector<4x256xf32>
    %211 = arith.addf %80, %210 : vector<4x256xf32>
    %212 = vector.extract_strided_slice %206 {offsets = [1, 0], sizes = [1, 256], strides = [1, 1]} : vector<4x256xf32> to vector<1x256xf32>
    %213 = vector.broadcast %17 : vector<4x1xf32> to vector<4x256xf32>
    %214 = vector.broadcast %212 : vector<1x256xf32> to vector<4x256xf32>
    %215 = arith.mulf %213, %214 : vector<4x256xf32>
    %216 = arith.addf %211, %215 : vector<4x256xf32>
    %217 = vector.extract_strided_slice %206 {offsets = [2, 0], sizes = [1, 256], strides = [1, 1]} : vector<4x256xf32> to vector<1x256xf32>
    %218 = vector.broadcast %26 : vector<4x1xf32> to vector<4x256xf32>
    %219 = vector.broadcast %217 : vector<1x256xf32> to vector<4x256xf32>
    %220 = arith.mulf %218, %219 : vector<4x256xf32>
    %221 = arith.addf %216, %220 : vector<4x256xf32>
    %222 = vector.extract_strided_slice %206 {offsets = [3, 0], sizes = [1, 256], strides = [1, 1]} : vector<4x256xf32> to vector<1x256xf32>
    %223 = vector.broadcast %35 : vector<4x1xf32> to vector<4x256xf32>
    %224 = vector.broadcast %222 : vector<1x256xf32> to vector<4x256xf32>
    %225 = arith.mulf %223, %224 : vector<4x256xf32>
    %226 = arith.addf %221, %225 : vector<4x256xf32>
    %227 = vector.extract_strided_slice %204 {offsets = [0, 0], sizes = [1, 256], strides = [1, 1]} : vector<4x256xf32> to vector<1x256xf32>
    %228 = vector.broadcast %44 : vector<4x1xf32> to vector<4x256xf32>
    %229 = vector.broadcast %227 : vector<1x256xf32> to vector<4x256xf32>
    %230 = arith.mulf %228, %229 : vector<4x256xf32>
    %231 = arith.addf %226, %230 : vector<4x256xf32>
    %232 = vector.extract_strided_slice %204 {offsets = [1, 0], sizes = [1, 256], strides = [1, 1]} : vector<4x256xf32> to vector<1x256xf32>
    %233 = vector.broadcast %53 : vector<4x1xf32> to vector<4x256xf32>
    %234 = vector.broadcast %232 : vector<1x256xf32> to vector<4x256xf32>
    %235 = arith.mulf %233, %234 : vector<4x256xf32>
    %236 = arith.addf %231, %235 : vector<4x256xf32>
    %237 = vector.extract_strided_slice %204 {offsets = [2, 0], sizes = [1, 256], strides = [1, 1]} : vector<4x256xf32> to vector<1x256xf32>
    %238 = vector.broadcast %62 : vector<4x1xf32> to vector<4x256xf32>
    %239 = vector.broadcast %237 : vector<1x256xf32> to vector<4x256xf32>
    %240 = arith.mulf %238, %239 : vector<4x256xf32>
    %241 = arith.addf %236, %240 : vector<4x256xf32>
    %242 = vector.extract_strided_slice %204 {offsets = [3, 0], sizes = [1, 256], strides = [1, 1]} : vector<4x256xf32> to vector<1x256xf32>
    %243 = vector.broadcast %71 : vector<4x1xf32> to vector<4x256xf32>
    %244 = vector.broadcast %242 : vector<1x256xf32> to vector<4x256xf32>
    %245 = arith.mulf %243, %244 : vector<4x256xf32>
    %246 = arith.addf %241, %245 : vector<4x256xf32>
    %247 = math.tanh %246 : vector<4x256xf32>
    %248 = vector.extract_strided_slice %163 {offsets = [4, 0], sizes = [4, 256], strides = [1, 1]} : vector<8x256xf32> to vector<4x256xf32>
    %249 = arith.mulf %206, %248 : vector<4x256xf32>
    %250 = tpu.concatenate %204, %247 in 0 : vector<4x256xf32>, vector<4x256xf32> -> vector<8x256xf32>
    %c8_75 = arith.constant 8 : index
    %c0_76 = arith.constant 0 : index
    %251 = vector.load %arg6[%c8_75, %c0_76] : memref<32x256xf32, #tpu.memory_space<vmem>>, vector<8x256xf32>
    tpu.vector_store %arg6[%c8_75, %c0_76], %250 {strides = array<i32>} : memref<32x256xf32, #tpu.memory_space<vmem>>, vector<8x256xf32>,
    %252 = tpu.concatenate %157, %206 in 0 : vector<4x256xf32>, vector<4x256xf32> -> vector<8x256xf32>
    %c8_77 = arith.constant 8 : index
    %c0_78 = arith.constant 0 : index
    %253 = vector.load %arg7[%c8_77, %c0_78] : memref<40x256xf32, #tpu.memory_space<vmem>>, vector<8x256xf32>
    tpu.vector_store %arg7[%c8_77, %c0_78], %252 {strides = array<i32>} : memref<40x256xf32, #tpu.memory_space<vmem>>, vector<8x256xf32>,
    %c16 = arith.constant 16 : index
    %c0_79 = arith.constant 0 : index
    %254 = vector.load %arg5[%c16, %c0_79] : memref<32x256xf32, #tpu.memory_space<vmem>>, vector<8x256xf32>
    %255 = math.exp %254 : vector<8x256xf32>
    %256 = vector.extract_strided_slice %249 {offsets = [0, 0], sizes = [1, 256], strides = [1, 1]} : vector<4x256xf32> to vector<1x256xf32>
    %257 = vector.broadcast %8 : vector<4x1xf32> to vector<4x256xf32>
    %258 = vector.broadcast %256 : vector<1x256xf32> to vector<4x256xf32>
    %259 = arith.mulf %257, %258 : vector<4x256xf32>
    %260 = arith.addf %80, %259 : vector<4x256xf32>
    %261 = vector.extract_strided_slice %249 {offsets = [1, 0], sizes = [1, 256], strides = [1, 1]} : vector<4x256xf32> to vector<1x256xf32>
    %262 = vector.broadcast %17 : vector<4x1xf32> to vector<4x256xf32>
    %263 = vector.broadcast %261 : vector<1x256xf32> to vector<4x256xf32>
    %264 = arith.mulf %262, %263 : vector<4x256xf32>
    %265 = arith.addf %260, %264 : vector<4x256xf32>
    %266 = vector.extract_strided_slice %249 {offsets = [2, 0], sizes = [1, 256], strides = [1, 1]} : vector<4x256xf32> to vector<1x256xf32>
    %267 = vector.broadcast %26 : vector<4x1xf32> to vector<4x256xf32>
    %268 = vector.broadcast %266 : vector<1x256xf32> to vector<4x256xf32>
    %269 = arith.mulf %267, %268 : vector<4x256xf32>
    %270 = arith.addf %265, %269 : vector<4x256xf32>
    %271 = vector.extract_strided_slice %249 {offsets = [3, 0], sizes = [1, 256], strides = [1, 1]} : vector<4x256xf32> to vector<1x256xf32>
    %272 = vector.broadcast %35 : vector<4x1xf32> to vector<4x256xf32>
    %273 = vector.broadcast %271 : vector<1x256xf32> to vector<4x256xf32>
    %274 = arith.mulf %272, %273 : vector<4x256xf32>
    %275 = arith.addf %270, %274 : vector<4x256xf32>
    %276 = vector.extract_strided_slice %247 {offsets = [0, 0], sizes = [1, 256], strides = [1, 1]} : vector<4x256xf32> to vector<1x256xf32>
    %277 = vector.broadcast %44 : vector<4x1xf32> to vector<4x256xf32>
    %278 = vector.broadcast %276 : vector<1x256xf32> to vector<4x256xf32>
    %279 = arith.mulf %277, %278 : vector<4x256xf32>
    %280 = arith.addf %275, %279 : vector<4x256xf32>
    %281 = vector.extract_strided_slice %247 {offsets = [1, 0], sizes = [1, 256], strides = [1, 1]} : vector<4x256xf32> to vector<1x256xf32>
    %282 = vector.broadcast %53 : vector<4x1xf32> to vector<4x256xf32>
    %283 = vector.broadcast %281 : vector<1x256xf32> to vector<4x256xf32>
    %284 = arith.mulf %282, %283 : vector<4x256xf32>
    %285 = arith.addf %280, %284 : vector<4x256xf32>
    %286 = vector.extract_strided_slice %247 {offsets = [2, 0], sizes = [1, 256], strides = [1, 1]} : vector<4x256xf32> to vector<1x256xf32>
    %287 = vector.broadcast %62 : vector<4x1xf32> to vector<4x256xf32>
    %288 = vector.broadcast %286 : vector<1x256xf32> to vector<4x256xf32>
    %289 = arith.mulf %287, %288 : vector<4x256xf32>
    %290 = arith.addf %285, %289 : vector<4x256xf32>
    %291 = vector.extract_strided_slice %247 {offsets = [3, 0], sizes = [1, 256], strides = [1, 1]} : vector<4x256xf32> to vector<1x256xf32>
    %292 = vector.broadcast %71 : vector<4x1xf32> to vector<4x256xf32>
    %293 = vector.broadcast %291 : vector<1x256xf32> to vector<4x256xf32>
    %294 = arith.mulf %292, %293 : vector<4x256xf32>
    %295 = arith.addf %290, %294 : vector<4x256xf32>
    %296 = math.tanh %295 : vector<4x256xf32>
    %297 = vector.extract_strided_slice %255 {offsets = [0, 0], sizes = [4, 256], strides = [1, 1]} : vector<8x256xf32> to vector<4x256xf32>
    %298 = arith.mulf %249, %297 : vector<4x256xf32>
    %299 = vector.extract_strided_slice %298 {offsets = [0, 0], sizes = [1, 256], strides = [1, 1]} : vector<4x256xf32> to vector<1x256xf32>
    %300 = vector.broadcast %8 : vector<4x1xf32> to vector<4x256xf32>
    %301 = vector.broadcast %299 : vector<1x256xf32> to vector<4x256xf32>
    %302 = arith.mulf %300, %301 : vector<4x256xf32>
    %303 = arith.addf %80, %302 : vector<4x256xf32>
    %304 = vector.extract_strided_slice %298 {offsets = [1, 0], sizes = [1, 256], strides = [1, 1]} : vector<4x256xf32> to vector<1x256xf32>
    %305 = vector.broadcast %17 : vector<4x1xf32> to vector<4x256xf32>
    %306 = vector.broadcast %304 : vector<1x256xf32> to vector<4x256xf32>
    %307 = arith.mulf %305, %306 : vector<4x256xf32>
    %308 = arith.addf %303, %307 : vector<4x256xf32>
    %309 = vector.extract_strided_slice %298 {offsets = [2, 0], sizes = [1, 256], strides = [1, 1]} : vector<4x256xf32> to vector<1x256xf32>
    %310 = vector.broadcast %26 : vector<4x1xf32> to vector<4x256xf32>
    %311 = vector.broadcast %309 : vector<1x256xf32> to vector<4x256xf32>
    %312 = arith.mulf %310, %311 : vector<4x256xf32>
    %313 = arith.addf %308, %312 : vector<4x256xf32>
    %314 = vector.extract_strided_slice %298 {offsets = [3, 0], sizes = [1, 256], strides = [1, 1]} : vector<4x256xf32> to vector<1x256xf32>
    %315 = vector.broadcast %35 : vector<4x1xf32> to vector<4x256xf32>
    %316 = vector.broadcast %314 : vector<1x256xf32> to vector<4x256xf32>
    %317 = arith.mulf %315, %316 : vector<4x256xf32>
    %318 = arith.addf %313, %317 : vector<4x256xf32>
    %319 = vector.extract_strided_slice %296 {offsets = [0, 0], sizes = [1, 256], strides = [1, 1]} : vector<4x256xf32> to vector<1x256xf32>
    %320 = vector.broadcast %44 : vector<4x1xf32> to vector<4x256xf32>
    %321 = vector.broadcast %319 : vector<1x256xf32> to vector<4x256xf32>
    %322 = arith.mulf %320, %321 : vector<4x256xf32>
    %323 = arith.addf %318, %322 : vector<4x256xf32>
    %324 = vector.extract_strided_slice %296 {offsets = [1, 0], sizes = [1, 256], strides = [1, 1]} : vector<4x256xf32> to vector<1x256xf32>
    %325 = vector.broadcast %53 : vector<4x1xf32> to vector<4x256xf32>
    %326 = vector.broadcast %324 : vector<1x256xf32> to vector<4x256xf32>
    %327 = arith.mulf %325, %326 : vector<4x256xf32>
    %328 = arith.addf %323, %327 : vector<4x256xf32>
    %329 = vector.extract_strided_slice %296 {offsets = [2, 0], sizes = [1, 256], strides = [1, 1]} : vector<4x256xf32> to vector<1x256xf32>
    %330 = vector.broadcast %62 : vector<4x1xf32> to vector<4x256xf32>
    %331 = vector.broadcast %329 : vector<1x256xf32> to vector<4x256xf32>
    %332 = arith.mulf %330, %331 : vector<4x256xf32>
    %333 = arith.addf %328, %332 : vector<4x256xf32>
    %334 = vector.extract_strided_slice %296 {offsets = [3, 0], sizes = [1, 256], strides = [1, 1]} : vector<4x256xf32> to vector<1x256xf32>
    %335 = vector.broadcast %71 : vector<4x1xf32> to vector<4x256xf32>
    %336 = vector.broadcast %334 : vector<1x256xf32> to vector<4x256xf32>
    %337 = arith.mulf %335, %336 : vector<4x256xf32>
    %338 = arith.addf %333, %337 : vector<4x256xf32>
    %339 = math.tanh %338 : vector<4x256xf32>
    %340 = vector.extract_strided_slice %255 {offsets = [4, 0], sizes = [4, 256], strides = [1, 1]} : vector<8x256xf32> to vector<4x256xf32>
    %341 = arith.mulf %298, %340 : vector<4x256xf32>
    %342 = tpu.concatenate %296, %339 in 0 : vector<4x256xf32>, vector<4x256xf32> -> vector<8x256xf32>
    %c16_80 = arith.constant 16 : index
    %c0_81 = arith.constant 0 : index
    %343 = vector.load %arg6[%c16_80, %c0_81] : memref<32x256xf32, #tpu.memory_space<vmem>>, vector<8x256xf32>
    tpu.vector_store %arg6[%c16_80, %c0_81], %342 {strides = array<i32>} : memref<32x256xf32, #tpu.memory_space<vmem>>, vector<8x256xf32>,
    %344 = tpu.concatenate %249, %298 in 0 : vector<4x256xf32>, vector<4x256xf32> -> vector<8x256xf32>
    %c16_82 = arith.constant 16 : index
    %c0_83 = arith.constant 0 : index
    %345 = vector.load %arg7[%c16_82, %c0_83] : memref<40x256xf32, #tpu.memory_space<vmem>>, vector<8x256xf32>
    tpu.vector_store %arg7[%c16_82, %c0_83], %344 {strides = array<i32>} : memref<40x256xf32, #tpu.memory_space<vmem>>, vector<8x256xf32>,
    %c24 = arith.constant 24 : index
    %c0_84 = arith.constant 0 : index
    %346 = vector.load %arg5[%c24, %c0_84] : memref<32x256xf32, #tpu.memory_space<vmem>>, vector<8x256xf32>
    %347 = math.exp %346 : vector<8x256xf32>
    %348 = vector.extract_strided_slice %341 {offsets = [0, 0], sizes = [1, 256], strides = [1, 1]} : vector<4x256xf32> to vector<1x256xf32>
    %349 = vector.broadcast %8 : vector<4x1xf32> to vector<4x256xf32>
    %350 = vector.broadcast %348 : vector<1x256xf32> to vector<4x256xf32>
    %351 = arith.mulf %349, %350 : vector<4x256xf32>
    %352 = arith.addf %80, %351 : vector<4x256xf32>
    %353 = vector.extract_strided_slice %341 {offsets = [1, 0], sizes = [1, 256], strides = [1, 1]} : vector<4x256xf32> to vector<1x256xf32>
    %354 = vector.broadcast %17 : vector<4x1xf32> to vector<4x256xf32>
    %355 = vector.broadcast %353 : vector<1x256xf32> to vector<4x256xf32>
    %356 = arith.mulf %354, %355 : vector<4x256xf32>
    %357 = arith.addf %352, %356 : vector<4x256xf32>
    %358 = vector.extract_strided_slice %341 {offsets = [2, 0], sizes = [1, 256], strides = [1, 1]} : vector<4x256xf32> to vector<1x256xf32>
    %359 = vector.broadcast %26 : vector<4x1xf32> to vector<4x256xf32>
    %360 = vector.broadcast %358 : vector<1x256xf32> to vector<4x256xf32>
    %361 = arith.mulf %359, %360 : vector<4x256xf32>
    %362 = arith.addf %357, %361 : vector<4x256xf32>
    %363 = vector.extract_strided_slice %341 {offsets = [3, 0], sizes = [1, 256], strides = [1, 1]} : vector<4x256xf32> to vector<1x256xf32>
    %364 = vector.broadcast %35 : vector<4x1xf32> to vector<4x256xf32>
    %365 = vector.broadcast %363 : vector<1x256xf32> to vector<4x256xf32>
    %366 = arith.mulf %364, %365 : vector<4x256xf32>
    %367 = arith.addf %362, %366 : vector<4x256xf32>
    %368 = vector.extract_strided_slice %339 {offsets = [0, 0], sizes = [1, 256], strides = [1, 1]} : vector<4x256xf32> to vector<1x256xf32>
    %369 = vector.broadcast %44 : vector<4x1xf32> to vector<4x256xf32>
    %370 = vector.broadcast %368 : vector<1x256xf32> to vector<4x256xf32>
    %371 = arith.mulf %369, %370 : vector<4x256xf32>
    %372 = arith.addf %367, %371 : vector<4x256xf32>
    %373 = vector.extract_strided_slice %339 {offsets = [1, 0], sizes = [1, 256], strides = [1, 1]} : vector<4x256xf32> to vector<1x256xf32>
    %374 = vector.broadcast %53 : vector<4x1xf32> to vector<4x256xf32>
    %375 = vector.broadcast %373 : vector<1x256xf32> to vector<4x256xf32>
    %376 = arith.mulf %374, %375 : vector<4x256xf32>
    %377 = arith.addf %372, %376 : vector<4x256xf32>
    %378 = vector.extract_strided_slice %339 {offsets = [2, 0], sizes = [1, 256], strides = [1, 1]} : vector<4x256xf32> to vector<1x256xf32>
    %379 = vector.broadcast %62 : vector<4x1xf32> to vector<4x256xf32>
    %380 = vector.broadcast %378 : vector<1x256xf32> to vector<4x256xf32>
    %381 = arith.mulf %379, %380 : vector<4x256xf32>
    %382 = arith.addf %377, %381 : vector<4x256xf32>
    %383 = vector.extract_strided_slice %339 {offsets = [3, 0], sizes = [1, 256], strides = [1, 1]} : vector<4x256xf32> to vector<1x256xf32>
    %384 = vector.broadcast %71 : vector<4x1xf32> to vector<4x256xf32>
    %385 = vector.broadcast %383 : vector<1x256xf32> to vector<4x256xf32>
    %386 = arith.mulf %384, %385 : vector<4x256xf32>
    %387 = arith.addf %382, %386 : vector<4x256xf32>
    %388 = math.tanh %387 : vector<4x256xf32>
    %389 = vector.extract_strided_slice %347 {offsets = [0, 0], sizes = [4, 256], strides = [1, 1]} : vector<8x256xf32> to vector<4x256xf32>
    %390 = arith.mulf %341, %389 : vector<4x256xf32>
    %391 = vector.extract_strided_slice %390 {offsets = [0, 0], sizes = [1, 256], strides = [1, 1]} : vector<4x256xf32> to vector<1x256xf32>
    %392 = vector.broadcast %8 : vector<4x1xf32> to vector<4x256xf32>
    %393 = vector.broadcast %391 : vector<1x256xf32> to vector<4x256xf32>
    %394 = arith.mulf %392, %393 : vector<4x256xf32>
    %395 = arith.addf %80, %394 : vector<4x256xf32>
    %396 = vector.extract_strided_slice %390 {offsets = [1, 0], sizes = [1, 256], strides = [1, 1]} : vector<4x256xf32> to vector<1x256xf32>
    %397 = vector.broadcast %17 : vector<4x1xf32> to vector<4x256xf32>
    %398 = vector.broadcast %396 : vector<1x256xf32> to vector<4x256xf32>
    %399 = arith.mulf %397, %398 : vector<4x256xf32>
    %400 = arith.addf %395, %399 : vector<4x256xf32>
    %401 = vector.extract_strided_slice %390 {offsets = [2, 0], sizes = [1, 256], strides = [1, 1]} : vector<4x256xf32> to vector<1x256xf32>
    %402 = vector.broadcast %26 : vector<4x1xf32> to vector<4x256xf32>
    %403 = vector.broadcast %401 : vector<1x256xf32> to vector<4x256xf32>
    %404 = arith.mulf %402, %403 : vector<4x256xf32>
    %405 = arith.addf %400, %404 : vector<4x256xf32>
    %406 = vector.extract_strided_slice %390 {offsets = [3, 0], sizes = [1, 256], strides = [1, 1]} : vector<4x256xf32> to vector<1x256xf32>
    %407 = vector.broadcast %35 : vector<4x1xf32> to vector<4x256xf32>
    %408 = vector.broadcast %406 : vector<1x256xf32> to vector<4x256xf32>
    %409 = arith.mulf %407, %408 : vector<4x256xf32>
    %410 = arith.addf %405, %409 : vector<4x256xf32>
    %411 = vector.extract_strided_slice %388 {offsets = [0, 0], sizes = [1, 256], strides = [1, 1]} : vector<4x256xf32> to vector<1x256xf32>
    %412 = vector.broadcast %44 : vector<4x1xf32> to vector<4x256xf32>
    %413 = vector.broadcast %411 : vector<1x256xf32> to vector<4x256xf32>
    %414 = arith.mulf %412, %413 : vector<4x256xf32>
    %415 = arith.addf %410, %414 : vector<4x256xf32>
    %416 = vector.extract_strided_slice %388 {offsets = [1, 0], sizes = [1, 256], strides = [1, 1]} : vector<4x256xf32> to vector<1x256xf32>
    %417 = vector.broadcast %53 : vector<4x1xf32> to vector<4x256xf32>
    %418 = vector.broadcast %416 : vector<1x256xf32> to vector<4x256xf32>
    %419 = arith.mulf %417, %418 : vector<4x256xf32>
    %420 = arith.addf %415, %419 : vector<4x256xf32>
    %421 = vector.extract_strided_slice %388 {offsets = [2, 0], sizes = [1, 256], strides = [1, 1]} : vector<4x256xf32> to vector<1x256xf32>
    %422 = vector.broadcast %62 : vector<4x1xf32> to vector<4x256xf32>
    %423 = vector.broadcast %421 : vector<1x256xf32> to vector<4x256xf32>
    %424 = arith.mulf %422, %423 : vector<4x256xf32>
    %425 = arith.addf %420, %424 : vector<4x256xf32>
    %426 = vector.extract_strided_slice %388 {offsets = [3, 0], sizes = [1, 256], strides = [1, 1]} : vector<4x256xf32> to vector<1x256xf32>
    %427 = vector.broadcast %71 : vector<4x1xf32> to vector<4x256xf32>
    %428 = vector.broadcast %426 : vector<1x256xf32> to vector<4x256xf32>
    %429 = arith.mulf %427, %428 : vector<4x256xf32>
    %430 = arith.addf %425, %429 : vector<4x256xf32>
    %431 = math.tanh %430 : vector<4x256xf32>
    %432 = vector.extract_strided_slice %347 {offsets = [4, 0], sizes = [4, 256], strides = [1, 1]} : vector<8x256xf32> to vector<4x256xf32>
    %433 = arith.mulf %390, %432 : vector<4x256xf32>
    %434 = tpu.concatenate %388, %431 in 0 : vector<4x256xf32>, vector<4x256xf32> -> vector<8x256xf32>
    %c24_85 = arith.constant 24 : index
    %c0_86 = arith.constant 0 : index
    %435 = vector.load %arg6[%c24_85, %c0_86] : memref<32x256xf32, #tpu.memory_space<vmem>>, vector<8x256xf32>
    tpu.vector_store %arg6[%c24_85, %c0_86], %434 {strides = array<i32>} : memref<32x256xf32, #tpu.memory_space<vmem>>, vector<8x256xf32>,
    %436 = tpu.concatenate %341, %390 in 0 : vector<4x256xf32>, vector<4x256xf32> -> vector<8x256xf32>
    %c24_87 = arith.constant 24 : index
    %c0_88 = arith.constant 0 : index
    %437 = vector.load %arg7[%c24_87, %c0_88] : memref<40x256xf32, #tpu.memory_space<vmem>>, vector<8x256xf32>
    tpu.vector_store %arg7[%c24_87, %c0_88], %436 {strides = array<i32>} : memref<40x256xf32, #tpu.memory_space<vmem>>, vector<8x256xf32>,
    %cst = arith.constant 0.000000e+00 : f32
    %438 = vector.broadcast %cst : f32 to vector<4x256xf32>
    %439 = tpu.concatenate %433, %438 in 0 : vector<4x256xf32>, vector<4x256xf32> -> vector<8x256xf32>
    %c32 = arith.constant 32 : index
    %c0_89 = arith.constant 0 : index
    %440 = vector.load %arg7[%c32, %c0_89] : memref<40x256xf32, #tpu.memory_space<vmem>>, vector<8x256xf32>
    tpu.vector_store %arg7[%c32, %c0_89], %439 {strides = array<i32>} : memref<40x256xf32, #tpu.memory_space<vmem>>, vector<8x256xf32>,
    return
  }
  func.func @transform_0(%arg0: i32) -> (i32, i32) {
    %c0_i32 = arith.constant 0 : i32
    %c0_i32_0 = arith.constant 0 : i32
    %c0_i32_1 = arith.constant 0 : i32
    return %c0_i32, %c0_i32_0 : i32, i32
  }
  func.func @transform_1(%arg0: i32) -> (i32, i32) {
    %c0_i32 = arith.constant 0 : i32
    %c0_i32_0 = arith.constant 0 : i32
    %c0_i32_1 = arith.constant 0 : i32
    return %c0_i32, %c0_i32_0 : i32, i32
  }
  func.func @transform_2(%arg0: i32) -> i32 {
    %c0_i32 = arith.constant 0 : i32
    %c0_i32_0 = arith.constant 0 : i32
    return %c0_i32 : i32
  }
  func.func @transform_3(%arg0: i32) -> i32 {
    %c0_i32 = arith.constant 0 : i32
    %c0_i32_0 = arith.constant 0 : i32
    return %c0_i32 : i32
  }
  func.func @transform_4(%arg0: i32) -> (i32, i32) {
    %c0_i32 = arith.constant 0 : i32
    %c0_i32_0 = arith.constant 0 : i32
    return %c0_i32, %arg0 : i32, i32
  }
  func.func @transform_5(%arg0: i32) -> (i32, i32) {
    %c0_i32 = arith.constant 0 : i32
    %c0_i32_0 = arith.constant 0 : i32
    return %c0_i32, %arg0 : i32, i32
  }
  func.func @transform_6(%arg0: i32) -> (i32, i32) {
    %c0_i32 = arith.constant 0 : i32
    %c0_i32_0 = arith.constant 0 : i32
    return %c0_i32, %arg0 : i32, i32
  }
}

</mosaic_0001>

<bundles_post_ra>
// kernel: tpu_custom_call.1
= control target key start
LH: loop header
LB: loop body
LE: loop exit
PB: predicated region body
PF: predicated region fallthrough
CT: control target
= control target key end

     0   :  { %s2970_s0 = inlined_call_operand.hbm [shape: f32[4,4], index: 0, kind: input, shape index: {}]   ;;  %s2971_s1 = inlined_call_operand.hbm [shape: f32[4,4], index: 1, kind: input, shape index: {}]   ;;  %s2972_s2 = inlined_call_operand.vmem [shape: f32[4], index: 2, kind: input, shape index: {}]   ;;  %s2973_s3 = inlined_call_operand.vmem [shape: f32[4], index: 3, kind: input, shape index: {}]   ;;  %s2974_s4 = inlined_call_operand.hbm [shape: f32[32,512], index: 4, kind: input, shape index: {}]   ;;  %s2975_s5 = inlined_call_operand.hbm [shape: f32[32,512], index: 5, kind: output, shape index: {0}]   ;;  %s2976_s6 = inlined_call_operand.hbm [shape: f32[40,512], index: 6, kind: output, shape index: {1}]  }
   0x1   :  { %2981 = sst [smem:[#allocation23_spill]] %s2970_s0 }
   0x2   :  { %2982 = sst [smem:[#allocation24_spill]] %s2971_s1 }
   0x3   :  { %2983 = sst [smem:[#allocation25_spill]] %s2972_s2 }
   0x4   :  { %2984 = sst [smem:[#allocation26_spill]] %s2973_s3 }
   0x5   :  { %12 = vsyncpa [#allocation5], 0 }
   0x6   :  { %13 = vsyncpa [#allocation8], 0 }
   0x7   :  { %14 = vsyncpa [#allocation6], 0 }
   0x8   :  { %15 = vsyncpa [#allocation11], 0 }
   0x9   :  { %16 = vsyncpa [#allocation3], 0 }
   0xa   :  { %18 = vsyncpa [#allocation3 + $0x1], 0 }
   0xb   :  { %19 = vsyncpa [#allocation4], 0 }
   0xc   :  { %21 = vsyncpa [#allocation4 + $0x1], 0 }
   0xd   :  { %22 = vsyncpa [#allocation15], 0 }
   0xe   :  { %24 = vsyncpa [#allocation15 + $0x1], 0  ;;  %s1972_s21 = smov 0   ;;  %s1974_s22 = smov 0  }
   0xf   :  { %s1976_s23 = smov 0   ;;  %s1978_s24 = smov 0  }
  0x10 LB: > { %s1993_s25 = sadd.s32 4294967295, %s1921_s24   ;;  %s1510_s26 = sadd.s32 4294967294, %s1921_s24   ;;  %s1921_s24 = sphi %s1978_s24, %s3029_s24   ;;  %s1917_s23 = sphi %s1976_s23, %s3028_s23   ;;  %s1913_s22 = sphi %s1974_s22, %s3027_s22   ;;  %s1909_s21 = sphi %s1972_s21, %s3026_s21  }
  0x11   : > { %p134_p0 = scmp.ne.s32.totalorder %s1913_s22, %s1909_s21  ;;  %p2977_p1 = scmp.eq.s32.totalorder %s1993_s25, 0 }
  0x12   : > { %p164_p3 = scmp.eq.s32.totalorder %s1510_s26, 1  ;;  %p1511_p5 = scmp.ge.s32.totalorder %s1921_s24, 1 }
  0x13   : > { %p2002_p4 = por %p2977_p1, %p134_p0  ;;  %p197_p7 = scmp.lt.s32.totalorder %s1921_s24, 3 }
  0x14   : > { %p2007_p6 = por %p164_p3, %p134_p0  ;;  %s2988_s2 = sld [smem:[#allocation25_spill]] }
  0x15   : > { %s2985_s27 = scalar_select %p2002_p4, 1, 0 }
  0x16   : > { %s2986_s28 = scalar_select %p2007_p6, 1, 0 }
  0x17   : > { %p2012_p8 = pnand %p1511_p5, %p197_p7  ;;  %s2989_s3 = sld [smem:[#allocation26_spill]] }
  0x18   : > { %s2991_s0 = sld [smem:[#allocation23_spill]] }
  0x19   : > { %p1596_p10 = pneg %p2012_p8 }
  0x1a   : > { %s228_s8 = sshll.u32 %s2988_s2, 4  ;;  %s2022_s8 = int_to_ptr.vmem [resolvable:$true] %s228_s8 }
  0x1b   : > { %p2029_p11 = pnand %p1596_p10, %p2977_p1 }
  0x1d   : > { %s239_s11 = sshll.u32 %s2989_s3, 4  ;;  %p1723_p13 = pneg %p2029_p11  ;;  %s2033_s11 = int_to_ptr.vmem [resolvable:$true] %s239_s11 }
  0x1e   : > { %s1721_s15 = scalar_lea.hbm %s2991_s0, 64 }
  0x1f   : > { %p1722_p12 = scmp.ne.s32.totalorder %s2991_s0, %s1721_s15  ;;  %p1728_p5 = scmp.lt.u32.totalorder %s1721_s15, %s2991_s0 }
  0x21   : > { %p1724_p0 = pnand %p1723_p13, %p1722_p12 }
  0x23   : > { %p1725_p3 = pneg %p1724_p0 }
  0x25   : > { %p1730_p7 = pnand %p1728_p5, %p1725_p3 }
  0x27   : > { %1733 = shalt.err (!%p1730_p7)
}
  0x28   : > { %s1923_s20 = smov [#allocation2]   ;;  %s2992_s1 = sld [smem:[#allocation24_spill]] }
  0x29   : > { %1599 = dma.hbm_to_smem (!%p2029_p11), %s2991_s0, 64, %s1923_s20, [#allocation5]  }
  0x2e   : > { %s1734_s10 = scalar_lea.hbm %s2992_s1, 64 }
  0x2f   : > { %p1735_p10 = scmp.ne.s32.totalorder %s2992_s1, %s1734_s10  ;;  %p1741_p3 = scmp.lt.u32.totalorder %s1734_s10, %s2992_s1 }
  0x31   : > { %p1737_p12 = pnand %p1735_p10, %p1723_p13 }
  0x33   : > { %p1738_p0 = pneg %p1737_p12 }
  0x35   : > { %p1743_p5 = pnand %p1741_p3, %p1738_p0 }
  0x37   : > { %1746 = shalt.err (!%p1743_p5)
}
  0x38   : > { %s1924_s17 = smov [#allocation7]   ;;  %s1747_s20 = scalar_lea.vmem %s2022_s8, 16 }
  0x39   : > { %1602 = dma.hbm_to_smem (!%p2029_p11), %s2992_s1, 64, %s1924_s17, [#allocation8]  }
  0x3a   : > { %p1748_p7 = scmp.ne.s32.totalorder %s2022_s8, %s1747_s20  ;;  %p1755_p0 = scmp.lt.s32.totalorder %s2022_s8, %s2022_s8 }
  0x3b   : > { %p1756_p3 = scmp.lt.s32.totalorder %s1747_s20, %s1747_s20 }
  0x3c   : > { %p1750_p10 = pnand %p1748_p7, %p1723_p13 }
  0x3d   : > { %p1757_p5 = por %p1756_p3, %p1755_p0 }
  0x3e   : > { %p1751_p12 = pneg %p1750_p10 }
  0x40   : > { %p1758_p9 = pnand %p1757_p5, %p1751_p12 }
  0x42   : > { %1761 = shalt.err (!%p1758_p9)
}
  0x43   : > { %s1925_s26 = smov [#allocation9]   ;;  %s1762_s30 = scalar_lea.vmem %s2033_s11, 16 }
  0x44   : > { %1605 = dma.vmem_to_smem (!%p2029_p11), %s2022_s8, 16, %s1925_s26, [#allocation6]  }
  0x45   : > { %p1763_p1 = scmp.ne.s32.totalorder %s2033_s11, %s1762_s30  ;;  %p1770_p2 = scmp.lt.s32.totalorder %s2033_s11, %s2033_s11 }
  0x46   : > { %p1771_p0 = scmp.lt.s32.totalorder %s1762_s30, %s1762_s30 }
  0x47   : > { %p1765_p7 = pnand %p1763_p1, %p1723_p13 }
  0x48   : > { %p1772_p12 = por %p1771_p0, %p1770_p2 }
  0x49   : > { %p1766_p10 = pneg %p1765_p7 }
  0x4b   : > { %p1773_p9 = pnand %p1772_p12, %p1766_p10 }
  0x4d   : > { %1776 = shalt.err (!%p1773_p9)
}
  0x4e   : > { %s1926_s7 = smov [#allocation10]   ;;  %s2092_s8 = sadd.s32 1, %s1921_s24  }
  0x4f   : > { %1608 = dma.vmem_to_smem (!%p2029_p11), %s2033_s11, 16, %s1926_s7, [#allocation11]  }
  0x50   : > { %s121_s9 = sadd.s32 1, %s1917_s23  ;;  %s118_s10 = ssub.s32 %s1921_s24, %s2092_s8 }
  0x51   : > { %p128_p1 = scmp.ne.s32.totalorder %s1917_s23, %s1913_s22  ;;  %p119_p2 = scmp.eq.s32.totalorder %s118_s10, 0 }
  0x52   : > { %p129_p13 = scmp.eq.s32.totalorder %s1921_s24, 0  ;;  %p2993_p3 = scmp.eq.s32.totalorder %s1993_s25, 1 }
  0x53   : > { %p1624_p7 = scmp.lt.s32.totalorder %s1921_s24, 2  ;;  %s250_s14 = sand.u32 1, %s1917_s23  }
  0x54   : > { %p2102_p5 = por %p2993_p3, %p128_p1  ;;  %p130_p10 = por %p129_p13, %p128_p1 }
  0x55   : > { %s2108_s13 = scalar_select %p119_p2, %s1917_s23, %s121_s9  }
  0x56   : > { %s2994_s12 = scalar_select %p2102_p5, 1, 0 }
  0x57   : > { %s1517_s15 = sshll.u32 %s250_s14, 6  ;;  %s1570_s11 = sshll.u32 %s1921_s24, 8 }
  0x58   : > { %s2115_s18 = scalar_lea.hbm %s2974_s4, %s1570_s11  ;;  %s254_s19 = scalar_lea.vmem [#allocation12], %s1517_s15 }
  0x59   : > { %s261_s20 = sshll.u32 %s254_s19, 4  ;;  %p2119_p11 = pnand %p1624_p7, %p130_p10  ;;  %s2117_s20 = int_to_ptr.vmem [resolvable:$true] %s261_s20 }
  0x5a   : > { %s2123_s30 = scalar_lea.sflag [#allocation3], %s250_s14  ;;  %s1777_s7 = scalar_lea.hbm %s2115_s18, 1024 }
  0x5b   : > { %p1778_p0 = scmp.ne.s32.totalorder %s2115_s18, %s1777_s7  ;;  %p1779_p12 = pneg %p2119_p11 }
  0x5c   : > { %s1782_s15 = scalar_lea.hbm %s2974_s4, 2048  ;;  %p1783_p2 = scmp.lt.u32.totalorder %s2115_s18, %s2974_s4 }
  0x5d   : > { %p1780_p9 = pnand %p1779_p12, %p1778_p0  ;;  %p1784_p13 = scmp.lt.u32.totalorder %s1782_s15, %s1777_s7 }
  0x5e   : > { %p1786_p7 = scmp.lt.u32.totalorder %s1777_s7, %s2115_s18 }
  0x5f   : > { %p1781_p1 = pneg %p1780_p9  ;;  %p1785_p3 = por %p1784_p13, %p1783_p2 }
  0x61   : > { %p1787_p10 = por %p1786_p7, %p1785_p3 }
  0x63   : > { %p1788_p6 = pnand %p1787_p10, %p1781_p1 }
  0x65   : > { %1791 = shalt.err (!%p1788_p6)
}
  0x66   : > { %s1792_s14 = scalar_lea.vmem %s2117_s20, 1024  ;;  %s1927_s17 = smov [#allocation12]  }
  0x67   : > { %p1793_p0 = scmp.ne.s32.totalorder %s2117_s20, %s1792_s14  ;;  %s1797_s19 = sshll.u32 %s1927_s17, 4  ;;  %s1798_s19 = int_to_ptr.vmem [resolvable:$false] %s1797_s19 }
  0x68   : > { %s1799_s9 = scalar_lea.vmem %s1798_s19, 2048  ;;  %p1800_p4 = scmp.lt.s32.totalorder %s2117_s20, %s1798_s19 }
  0x69   : > { %p1795_p9 = pnand %p1793_p0, %p1779_p12  ;;  %p1801_p2 = scmp.lt.s32.totalorder %s1799_s9, %s1792_s14 }
  0x6b   : > { %p1796_p5 = pneg %p1795_p9  ;;  %p1802_p13 = por %p1801_p2, %p1800_p4 }
  0x6d   : > { %p1803_p3 = pnand %p1802_p13, %p1796_p5 }
  0x6f   : > { %1806 = shalt.err (!%p1803_p3)
}
  0x70   : > { %s1928_s7 = smov 512   ;;  %s1929_s10 = smov 256  }
  0x71   : > { %s1930_s15 = smov 16   ;;  %273 = sbr.rel (%p2012_p8) target bundleno = 496 (0x1f0), region = 40 }
  0x72   : > { %1612 = dma.hbm_to_vmem [thread:$0]  (!%p2119_p11), %s2115_s18, 1024, %s2117_s20, %s2123_s30, %s1928_s7, %s1929_s10, %s1930_s15  }
  0x73   : > { %p2996_p6 = scmp.eq.s32.totalorder (!%p2012_p8), %s1993_s25, 0 }
  0x78   : > { %1880 = dma.done.wait (%p2996_p6), [#allocation5], 64   ;;  %p2997_p12 = pmov %p2996_p6 }
  0x79   : > { %p2998_p4 = pmov %p2996_p6 }
  0x7a   : > { %1882 = vsyncadd (%p2997_p12), [#allocation5], 4294967232 }
  0x7b   : > { %1884 = dma.done.wait (%p2998_p4), [#allocation8], 64   ;;  %p2999_p5 = pmov %p2998_p4 }
  0x7c   : > { %p3000_p1 = pmov %p2998_p4 }
  0x7d   : > { %1886 = vsyncadd (%p2999_p5), [#allocation8], 4294967232 }
  0x7e   : > { %1888 = dma.done.wait (%p3000_p1), [#allocation6], 16   ;;  %p3001_p11 = pmov %p3000_p1 }
  0x7f   : > { %p3002_p8 = pmov %p3000_p1 }
  0x80   : > { %1890 = vsyncadd (%p3001_p11), [#allocation6], 4294967280 }
  0x81   : > { %1892 = dma.done.wait (%p3002_p8), [#allocation11], 16   ;;  %p3003_p7 = pmov %p3000_p1 }
  0x82   : > { %s2170_s29 = sand.u32 1, %s1913_s22   ;;  %p3004_p10 = scmp.ne.s32.totalorder %s2985_s27, 0 }
  0x83   : > { %1894 = vsyncadd (%p3003_p7), [#allocation11], 4294967280  ;;  %s2980_s18 = sshll.u32 %s2170_s29, 6  ;;  %s292_s20 = scalar_lea.sflag [#allocation3], %s2170_s29 }
  0x84   : > { %s2176_s26 = scalar_lea.vmem [#allocation12], %s2980_s18 }
  0x85   : > { %1896 = dma.done.wait (%p3004_p10), %s292_s20, 1024  }
  0x86   : > { %1898 = vsyncadd (%p3004_p10), %s292_s20, 4294966272 }
  0x87   : > { %300 = sfence }
  0x88   : > { %s1534_s30 = sld [smem:[#allocation2 + $0x100]]  ;;  %v1931_v0 = vmov 0   ;;  %s1535_s11 = sld [smem:[#allocation2 + $0x101]]  ;;  %vm341_vm0 = vcmask 1040384   ;;  %vm343_vm1 = vcmask 1041408   ;;  %vm345_vm2 = vcmask 1042432  }
  0x89   : > { %1674 = vset.pattern.permute.xlu1 %v1931_v0  ;;  %1673 = vset.pattern.permute.xlu0 %v1931_v0  ;;  %s1536_s16 = sld [smem:[#allocation2 + $0x102]]  ;;  %s1537_s14 = sld [smem:[#allocation2 + $0x103]]  ;;  %vm611_vm3 = vcmask 1043456  }
  0x8a   : > { %s424_s17 = sld [smem:[#allocation9]]  ;;  %s1557_s19 = sld [smem:[#allocation9 + $0x1]] }
  0x8b   : > { %s2182_s9 = sld [smem:[#allocation9 + $0x2]]  ;;  %s2184_s7 = sld [smem:[#allocation9 + $0x3]] }
  0x8c   : > { %s2186_s10 = sld [smem:[#allocation10]]  ;;  %s2188_s15 = sld [smem:[#allocation10 + $0x1]] }
  0x8d   : > { %s2190_s27 = sld [smem:[#allocation10 + $0x2]]  ;;  %s2192_s20 = sld [smem:[#allocation10 + $0x3]] }
  0x8e   : > { %v359_v1 = vstv %s1534_s30  ;;  %s2194_s18 = sld [smem:[#allocation2]]  ;;  %v361_v2 = vstv %s1535_s11  ;;  %s2196_s0 = sld [smem:[#allocation2 + $0x1]] }
  0x8f   : > { %v363_v3 = vstv %s1536_s16  ;;  %s2198_s1 = sld [smem:[#allocation2 + $0x2]]  ;;  %v365_v4 = vstv %s1537_s14  ;;  %v366_v5 = vsel %vm341_vm0, %v359_v1, %v361_v2  ;;  %s2201_s30 = sld [smem:[#allocation2 + $0x3]] }
  0x90   : > { %v425_v6 = vstv %s424_s17  ;;  %s2203_s2 = sld [smem:[#allocation2 + $0x180]]  ;;  %v367_v7 = vsel %vm343_vm1, %v366_v5, %v363_v3  ;;  %v427_v8 = vstv %s1557_s19  ;;  %s2207_s11 = sld [smem:[#allocation2 + $0x181]] }
  0x91   : > { %v429_v9 = vstv %s2182_s9  ;;  %s2209_s16 = sld [smem:[#allocation2 + $0x182]]  ;;  %v368_v10 = vsel %vm345_vm2, %v367_v7, %v365_v4  ;;  %v431_v11 = vstv %s2184_s7  ;;  %v432_v12 = vsel %vm341_vm0, %v425_v6, %v427_v8  ;;  %s2215_s14 = sld [smem:[#allocation2 + $0x183]]  ;;  %v446_v7 = vld [vmem:[%s2176_s26] sm:$0xff]  ;;  %v447_v8 = vld [vmem:[%s2176_s26 + $0x8] sm:$0xff] }
  0x92   : > { %v436_v13 = vstv %s2186_s10  ;;  %s2217_s17 = sld [smem:[#allocation2 + $0x80]]  ;;  %v433_v14 = vsel %vm343_vm1, %v432_v12, %v429_v9  ;;  %v438_v15 = vstv %s2188_s15  ;;  %476 = vperm.xlu1 %1674, %v368_v10   ;;  %s2222_s19 = sld [smem:[#allocation2 + $0x81]]  ;;  %v448_v9 = vmul.f32 1.442695, %v446_v7  ;;  %v627_v12 = vld [vmem:[%s2176_s26 + $0x18] sm:$0xff] }
  0x93   : > { %v440_v16 = vstv %s2190_s27  ;;  %s2224_s9 = sld [smem:[#allocation2 + $0x82]]  ;;  %v2227_v17 = vsel %vm345_vm2, %v433_v14, %v431_v11  ;;  %v442_v18 = vstv %s2192_s20  ;;  %v443_v19 = vsel %vm341_vm0, %v436_v13, %v438_v15  ;;  %s2232_s7 = sld [smem:[#allocation2 + $0x83]]  ;;  %v626_v11 = vld [vmem:[%s2176_s26 + $0x10] sm:$0xff]  ;;  %v858_v15 = vld [vmem:[%s2176_s26 + $0x20] sm:$0xff] }
  0x94   : > { %v334_v20 = vstv %s2194_s18  ;;  %s2234_s10 = sld [smem:[#allocation7 + $0x80]]  ;;  %v444_v21 = vsel %vm343_vm1, %v443_v19, %v440_v16  ;;  %v336_v22 = vstv %s2196_s0  ;;  %s2239_s15 = sld [smem:[#allocation7 + $0x81]]  ;;  %v450_v10 = vmul.f32 1.442695, %v447_v8 }
  0x95   : > { %v338_v23 = vstv %s2198_s1  ;;  %s2241_s27 = sld [smem:[#allocation7 + $0x82]]  ;;  %v2244_v24 = vsel %vm345_vm2, %v444_v21, %v442_v18  ;;  %v340_v25 = vstv %s2201_s30  ;;  %v342_v26 = vsel %vm341_vm0, %v334_v20, %v336_v22  ;;  %s2249_s18 = sld [smem:[#allocation7 + $0x83]]  ;;  %v859_v18 = vld [vmem:[%s2176_s26 + $0x28] sm:$0xff] }
  0x96   : > { %v370_v27 = vstv %s2203_s2  ;;  %s2251_s20 = sld [smem:[#allocation7]]  ;;  %v344_v28 = vsel %vm343_vm1, %v342_v26, %v338_v23  ;;  %v372_v29 = vstv %s2207_s11  ;;  %s2256_s0 = sld [smem:[#allocation7 + $0x1]]  ;;  %1675 = vpow2.f32 %v448_v9 }
  0x97   : > { %v374_v30 = vstv %s2209_s16  ;;  %s2258_s1 = sld [smem:[#allocation7 + $0x2]]  ;;  %v346_v31 = vsel %vm345_vm2, %v344_v28, %v340_v25  ;;  %v376_v32 = vstv %s2215_s14  ;;  %v377_v33 = vsel %vm341_vm0, %v370_v27, %v372_v29  ;;  %s2263_s2 = sld [smem:[#allocation7 + $0x3]]  ;;  %v1090_v29 = vld [vmem:[%s2176_s26 + $0x30] sm:$0xff] }
  0x98   : > { %s2265_s30 = sld [smem:[#allocation7 + $0x180]]  ;;  %454 = vperm.xlu0 %1673, %v346_v31   ;;  %v378_v34 = vsel %vm343_vm1, %v377_v33, %v374_v30  ;;  %v348_v35 = vstv %s2217_s17  ;;  %v350_v36 = vstv %s2222_s19  ;;  %s2271_s11 = sld [smem:[#allocation7 + $0x181]]  ;;  %1677 = vpow2.f32 %v450_v10 }
  0x99   : > { %v352_v37 = vstv %s2224_s9  ;;  %s2273_s16 = sld [smem:[#allocation7 + $0x182]]  ;;  %v379_v38 = vsel %vm345_vm2, %v378_v34, %v376_v32  ;;  %v354_v39 = vstv %s2232_s7  ;;  %v355_v40 = vsel %vm341_vm0, %v348_v35, %v350_v36  ;;  %s2279_s14 = sld [smem:[#allocation7 + $0x183]]  ;;  %v1091_v32 = vld [vmem:[%s2176_s26 + $0x38] sm:$0xff] }
  0x9a   : > { %v392_v41 = vstv %s2234_s10  ;;  %s2281_s3 = sld [smem:[#allocation7 + $0x100]]  ;;  %487 = vperm.xlu1 %1674, %v379_v38   ;;  %v356_v42 = vsel %vm343_vm1, %v355_v40, %v352_v37  ;;  %v394_v43 = vstv %s2239_s15  ;;  %s1550_s17 = sld [smem:[#allocation7 + $0x101]]  ;;  %v628_v13 = vmul.f32 1.442695, %v626_v11 }
  0x9b   : > { %v396_v44 = vstv %s2241_s27  ;;  %s1551_s19 = sld [smem:[#allocation7 + $0x102]]  ;;  %v357_v45 = vsel %vm345_vm2, %v356_v42, %v354_v39  ;;  %v398_v46 = vstv %s2249_s18  ;;  %v399_v47 = vsel %vm341_vm0, %v392_v41, %v394_v43  ;;  %s1552_s9 = sld [smem:[#allocation7 + $0x103]] }
  0x9c   : > { %v381_v48 = vstv %s2251_s20  ;;  %465 = vperm.xlu0 %1673, %v357_v45   ;;  %v400_v49 = vsel %vm343_vm1, %v399_v47, %v396_v44  ;;  %v383_v50 = vstv %s2256_s0  ;;  %v630_v14 = vmul.f32 1.442695, %v627_v12  ;;  %s1571_s7 = sshll.u32 %s1993_s25, 8  ;;  %s1573_s10 = smul.u32 80, %s2170_s29 }
  0x9d   : > { %v385_v51 = vstv %s2258_s1  ;;  %v401_v52 = vsel %vm345_vm2, %v400_v49, %v398_v46  ;;  %v387_v53 = vstv %s2263_s2  ;;  %v388_v54 = vsel %vm341_vm0, %v381_v48, %v383_v50  ;;  %s2757_s18 = scalar_lea.hbm %s2976_s6, %s1571_s7  ;;  %s1332_s1 = scalar_lea.sflag [#allocation15], %s2170_s29 }
  0x9e   : > { %v414_v55 = vstv %s2265_s30  ;;  %561 = vperm.xlu1 %1674, %v401_v52   ;;  %v389_v56 = vsel %vm343_vm1, %v388_v54, %v385_v51  ;;  %v416_v57 = vstv %s2271_s11  ;;  %1679 = vpow2.f32 %v628_v13  ;;  %s329_s20 = scalar_lea.vmem [#allocation14], %s1573_s10  ;;  %p3023_p9 = scmp.ne.s32.totalorder %s2994_s12, 0 }
  0x9f   : > { %v418_v58 = vstv %s2273_s16  ;;  %v390_v59 = vsel %vm345_vm2, %v389_v56, %v387_v53  ;;  %v420_v60 = vstv %s2279_s14  ;;  %v421_v61 = vsel %vm341_vm0, %v414_v55, %v416_v57  ;;  %s1361_s0 = sshll.u32 %s329_s20, 4  ;;  %s1932_s30 = smov [#allocation14]   ;;  %s2771_s0 = int_to_ptr.vmem [resolvable:$true] %s1361_s0 }
  0xa0   : > { %v403_v62 = vstv %s2281_s3  ;;  %549 = vperm.xlu0 %1673, %v390_v59   ;;  %v422_v63 = vsel %vm343_vm1, %v421_v61, %v418_v58  ;;  %v405_v0 = vstv %s1550_s17  ;;  %1681 = vpow2.f32 %v630_v14  ;;  %v1676_v16 = vpop.eup %1675  ;;  %s3022_s3 = sshll.u32 %s2170_s29, 6  ;;  %s1807_s2 = scalar_lea.vmem %s2771_s0, 1280 }
  0xa1   : > { %v407_v1 = vstv %s1551_s19  ;;  %v423_v2 = vsel %vm345_vm2, %v422_v63, %v420_v60  ;;  %v409_v3 = vstv %s1552_s9  ;;  %v410_v4 = vsel %vm341_vm0, %v403_v62, %v405_v0  ;;  %s2714_s26 = scalar_lea.vmem [#allocation13], %s3022_s3  ;;  %p1808_p0 = scmp.ne.s32.totalorder %s2771_s0, %s1807_s2 }
  0xa2   : > { %585 = vperm.xlu1 %1674, %v423_v2   ;;  %v411_v5 = vsel %vm343_vm1, %v410_v4, %v407_v1  ;;  %v1678_v19 = vpop.eup %1677  ;;  %v860_v20 = vmul.f32 1.442695, %v858_v15  ;;  %v2316_v21 = vmul.f32 %v1676_v16, %v2244_v24  ;;  %v599_v22 = vrot.slane %v1676_v16, 4  ;;  %s1811_s11 = sshll.u32 %s1932_s30, 4  ;;  %s1812_s11 = int_to_ptr.vmem [resolvable:$false] %s1811_s11 }
  0xa3   : > { %v412_v6 = vsel %vm345_vm2, %v411_v5, %v409_v3  ;;  %v862_v23 = vmul.f32 1.442695, %v859_v18  ;;  %v2319_v25 = vmul.f32 %v1678_v19, %v2244_v24  ;;  %v600_v26 = vrot.slane %v1678_v19, 4  ;;  %p1809_p2 = pnand %p1808_p0, %p3023_p9  ;;  %s1813_s16 = scalar_lea.vmem %s1812_s11, 2560 }
  0xa4   : > { %573 = vperm.xlu0 %1673, %v412_v6   ;;  %v457_v27 = vlaneseq  ;;  %1683 = vpow2.f32 %v860_v20  ;;  %v2322_v28 = vmul.f32 %v599_v22, %v2316_v21  ;;  %v1092_v35 = vmul.f32 1.442695, %v1090_v29  ;;  %p1814_p3 = scmp.lt.s32.totalorder %s2771_s0, %s1812_s11  ;;  %p1815_p6 = scmp.lt.s32.totalorder %s1813_s16, %s1807_s2 }
  0xa5   : > { %1685 = vpow2.f32 %v862_v23  ;;  %v2326_v31 = vmul.f32 %v600_v26, %v2319_v25  ;;  %v1094_v38 = vmul.f32 1.442695, %v1091_v32  ;;  %p1810_p13 = pneg %p1809_p2 }
  0xa6   : > { %v458_v34 = vshrl.u32 %v457_v27, 7  ;;  %1687 = vpow2.f32 %v1092_v35  ;;  %p1816_p12 = por %p1815_p6, %p1814_p3 }
  0xa7   : > { %1689 = vpow2.f32 %v1094_v38 }
  0xa8   : > { %v1680_v30 = vpop.eup %1679  ;;  %v2335_v41 = vsub.s32 2, %v458_v34  ;;  %v2337_v42 = vsub.s32 0, %v458_v34  ;;  %v2339_v43 = vsub.s32 3, %v458_v34  ;;  %v2347_v48 = vsub.s32 1, %v458_v34  ;;  %p1817_p4 = pnand %p1816_p12, %p1810_p13 }
  0xa9   : > { %v2330_v36 = vmul.f32 %v1680_v30, %v2322_v28  ;;  %v832_v37 = vrot.slane %v1680_v30, 4 }
  0xaa   : > { %v1682_v33 = vpop.eup %1681  ;;  %v482_v49 = vrot.slane %v2244_v24, %v2335_v41  ;;  %v460_v50 = vrot.slane %v2244_v24, %v2337_v42  ;;  %v493_v51 = vrot.slane %v2244_v24, %v2339_v43  ;;  %v502_v52 = vrot.slane %v2316_v21, %v2337_v42 }
  0xab   : > { %v2333_v39 = vmul.f32 %v1682_v33, %v2326_v31  ;;  %v833_v40 = vrot.slane %v1682_v33, 4  ;;  %v2342_v44 = vmul.f32 %v832_v37, %v2330_v36  ;;  %v506_v55 = vrot.slane %v2319_v25, %v2337_v42 }
  0xac   : > { %v526_v56 = vrot.slane %v2316_v21, %v2335_v41  ;;  %v471_v59 = vrot.slane %v2244_v24, %v2347_v48  ;;  %v514_v60 = vrot.slane %v2316_v21, %v2347_v48  ;;  %v518_v61 = vrot.slane %v2319_v25, %v2347_v48 }
  0xad   : > { %v2345_v46 = vmul.f32 %v833_v40, %v2333_v39  ;;  %v530_v62 = vrot.slane %v2319_v25, %v2335_v41  ;;  %v538_v63 = vrot.slane %v2316_v21, %v2339_v43  ;;  %v542_v0 = vrot.slane %v2319_v25, %v2339_v43 }
  0xae   : > { %v1684_v45 = vpop.eup %1683  ;;  %v739_v1 = vrot.slane %v2333_v39, %v2337_v42  ;;  %v751_v2 = vrot.slane %v2333_v39, %v2347_v48  ;;  %v763_v3 = vrot.slane %v2333_v39, %v2335_v41  ;;  %v867_v4 = vrot.slane %v2342_v44, %v2337_v42 }
  0xaf   : > { %v1686_v47 = vpop.eup %1685  ;;  %v2358_v53 = vmul.f32 %v1684_v45, %v2342_v44  ;;  %v1064_v54 = vrot.slane %v1684_v45, 4  ;;  %v871_v5 = vrot.slane %v2345_v46, %v2337_v42  ;;  %v879_v8 = vrot.slane %v2342_v44, %v2347_v48 }
  0xb0   : > { %v2365_v57 = vmul.f32 %v1686_v47, %v2345_v46  ;;  %v1065_v58 = vrot.slane %v1686_v47, 4  ;;  %v2392_v7 = vpop.eup %1687  ;;  %v883_v9 = vrot.slane %v2345_v46, %v2347_v48  ;;  %v891_v10 = vrot.slane %v2342_v44, %v2335_v41 }
  0xb1   : > { %v2390_v6 = vmul.f32 %v1064_v54, %v2358_v53  ;;  %v2403_v12 = vpop.eup %1689  ;;  %v895_v13 = vrot.slane %v2345_v46, %v2335_v41  ;;  %v903_v14 = vrot.slane %v2342_v44, %v2339_v43  ;;  %v967_v16 = vrot.slane %v2358_v53, %v2337_v42 }
  0xb2   : > { %v2401_v11 = vmul.f32 %v1065_v58, %v2365_v57  ;;  %v991_v20 = vrot.slane %v2358_v53, %v2335_v41  ;;  %v995_v26 = vrot.slane %v2365_v57, %v2335_v41 }
  0xb3   : > { %v2429_v29 = vmul.f32 %v2392_v7, %v2390_v6  ;;  %v1123_v35 = vrot.slane %v2390_v6, %v2335_v41 }
  0xb4   : > { %v2443_v37 = vmul.f32 %v2403_v12, %v2401_v11  ;;  %v1127_v27 = vrot.slane %v2401_v11, %v2335_v41 }
 0x111   : > { %v2431_v30 = vpop.permute.xlu1 %476 }
 0x112   : > { %v765_v18 = vmul.f32 %v763_v3, %v2431_v30 }
 0x117   : > { %v2433_v32 = vpop.permute.xlu0 %454 }
 0x118   : > { %v461_v38 = vmul.f32 %v460_v50, %v2433_v32  ;;  %v507_v40 = vmul.f32 %v502_v52, %v2433_v32  ;;  %v508_v45 = vmul.f32 %v506_v55, %v2433_v32  ;;  %v1223_v55 = vrot.slane %v2429_v29, %v2335_v41 }
 0x119   : > { %v741_v22 = vmul.f32 %v739_v1, %v2433_v32  ;;  %v2481_v47 = vpop.permute.xlu1 %487 }
 0x11a   : > { %v462_v58 = vadd.f32 %v461_v38, %v2227_v17  ;;  %v509_v54 = vadd.f32 %v507_v40, %v2227_v17  ;;  %v510_v52 = vadd.f32 %v508_v45, %v2227_v17  ;;  %v483_v38 = vmul.f32 %v482_v49, %v2431_v30 }
 0x11b   : > { %v2467_v34 = vpop.permute.xlu0 %465  ;;  %v1227_v40 = vrot.slane %v2443_v37, %v2335_v41  ;;  %v532_v49 = vmul.f32 %v530_v62, %v2431_v30  ;;  %v743_v1 = vadd.f32 %v741_v22, %v2227_v17  ;;  %v897_v22 = vmul.f32 %v895_v13, %v2431_v30 }
 0x11c   : > { %v472_v33 = vmul.f32 %v471_v59, %v2467_v34  ;;  %v519_v15 = vmul.f32 %v514_v60, %v2467_v34  ;;  %v520_v23 = vmul.f32 %v518_v61, %v2467_v34  ;;  %v1239_v59 = vrot.slane %v2443_v37, %v2339_v43 }
 0x11d   : > { %v531_v61 = vmul.f32 %v526_v56, %v2431_v30  ;;  %v753_v19 = vmul.f32 %v751_v2, %v2467_v34  ;;  %v872_v56 = vmul.f32 %v867_v4, %v2433_v32  ;;  %v996_v2 = vmul.f32 %v991_v20, %v2431_v30 }
 0x11e   : > { %v473_v45 = vadd.f32 %v472_v33, %v462_v58  ;;  %v521_v60 = vadd.f32 %v519_v15, %v509_v54  ;;  %v522_v50 = vadd.f32 %v520_v23, %v510_v52  ;;  %v494_v15 = vmul.f32 %v493_v51, %v2481_v47 }
 0x11f   : > { %v896_v33 = vmul.f32 %v891_v10, %v2431_v30  ;;  %v755_v54 = vadd.f32 %v753_v19, %v743_v1  ;;  %v997_v52 = vmul.f32 %v995_v26, %v2431_v30  ;;  %v1128_v51 = vmul.f32 %v1123_v35, %v2431_v30 }
 0x120   : > { %v484_v23 = vadd.f32 %v483_v38, %v473_v45  ;;  %v533_v62 = vadd.f32 %v531_v61, %v521_v60  ;;  %v534_v58 = vadd.f32 %v532_v49, %v522_v50  ;;  %v543_v38 = vmul.f32 %v538_v63, %v2481_v47 }
 0x121   : > { %v544_v4 = vmul.f32 %v542_v0, %v2481_v47  ;;  %v2521_v10 = vadd.f32 %v765_v18, %v755_v54  ;;  %v1129_v13 = vmul.f32 %v1127_v27, %v2431_v30  ;;  %v873_v19 = vmul.f32 %v871_v5, %v2433_v32 }
 0x122   : > { %v495_v3 = vadd.f32 %v494_v15, %v484_v23  ;;  %v874_v20 = vadd.f32 %v872_v56, %v2227_v17  ;;  %v884_v63 = vmul.f32 %v879_v8, %v2467_v34  ;;  %v545_v26 = vadd.f32 %v543_v38, %v533_v62 }
 0x123   : > { %v885_v0 = vmul.f32 %v883_v9, %v2467_v34  ;;  %v1228_v18 = vmul.f32 %v1223_v55, %v2431_v30  ;;  %v1229_v27 = vmul.f32 %v1227_v40, %v2431_v30  ;;  %v546_v35 = vadd.f32 %v544_v4, %v534_v58 }
 0x124   : > { %1691 = vtanh.f32 %v495_v3  ;;  %v875_v5 = vadd.f32 %v873_v19, %v2227_v17  ;;  %v886_v50 = vadd.f32 %v884_v63, %v874_v20  ;;  %v972_v1 = vmul.f32 %v967_v16, %v2433_v32 }
 0x125   : > { %v908_v8 = vmul.f32 %v903_v14, %v2481_v47  ;;  %v3005_v9 = vrot.slane %v2365_v57, %v2337_v42  ;;  %v3006_v40 = vrot.slane %v2358_v53, %v2347_v48  ;;  %v3007_v60 = vrot.slane %v2365_v57, %v2347_v48 }
 0x126   : > { %v887_v61 = vadd.f32 %v885_v0, %v875_v5  ;;  %v898_v49 = vadd.f32 %v896_v33, %v886_v50  ;;  %v3008_v14 = vrot.slane %v2345_v46, %v2339_v43  ;;  %v974_v23 = vadd.f32 %v972_v1, %v2227_v17 }
 0x127   : > { %v973_v55 = vmul.f32 %v3005_v9, %v2433_v32  ;;  %v984_v45 = vmul.f32 %v3006_v40, %v2467_v34  ;;  %v985_v16 = vmul.f32 %v3007_v60, %v2467_v34  ;;  %v3009_v62 = vrot.slane %v2390_v6, %v2337_v42 }
 0x128   : > { %v909_v15 = vmul.f32 %v3008_v14, %v2481_v47  ;;  %v3010_v3 = vrot.slane %v2401_v11, %v2337_v42  ;;  %v3011_v33 = vrot.slane %v2390_v6, %v2347_v48  ;;  %v899_v4 = vadd.f32 %v897_v22, %v887_v61 }
 0x129   : > { %v975_v56 = vadd.f32 %v973_v55, %v2227_v17  ;;  %v1104_v54 = vmul.f32 %v3009_v62, %v2433_v32  ;;  %v2578_v19 = vadd.f32 %v908_v8, %v898_v49  ;;  %v986_v20 = vadd.f32 %v984_v45, %v974_v23 }
 0x12a   : > { %v1105_v58 = vmul.f32 %v3010_v3, %v2433_v32  ;;  %v1116_v38 = vmul.f32 %v3011_v33, %v2467_v34  ;;  %v3012_v63 = vrot.slane %v2401_v11, %v2347_v48  ;;  %v3013_v50 = vrot.slane %v2358_v53, %v2339_v43 }
 0x12b   : > { %v987_v5 = vadd.f32 %v985_v16, %v975_v56  ;;  %v1106_v9 = vadd.f32 %v1104_v54, %v2227_v17  ;;  %v2590_v40 = vadd.f32 %v909_v15, %v899_v4  ;;  %v998_v22 = vadd.f32 %v996_v2, %v986_v20  ;;  %v2606_v2 = vpop.permute.xlu0 %549 }
 0x12c   : > { %v1117_v0 = vmul.f32 %v3012_v63, %v2467_v34  ;;  %v1008_v1 = vmul.f32 %v3013_v50, %v2481_v47  ;;  %v1107_v55 = vadd.f32 %v1105_v58, %v2227_v17  ;;  %v3014_v8 = vrot.slane %v2365_v57, %v2339_v43  ;;  %v2631_v50 = vpop.permute.xlu1 %561 }
 0x12d   : > { %v3015_v60 = vrot.slane %v2429_v29, %v2337_v42  ;;  %v999_v61 = vadd.f32 %v997_v52, %v987_v5  ;;  %v1118_v49 = vadd.f32 %v1116_v38, %v1106_v9  ;;  %v3016_v23 = vrot.slane %v2443_v37, %v2337_v42 }
 0x12e   : > { %v1009_v45 = vmul.f32 %v3014_v8, %v2481_v47  ;;  %v1119_v14 = vadd.f32 %v1117_v0, %v1107_v55  ;;  %v2604_v56 = vpop.eup %1691  ;;  %v2608_v62 = vadd.f32 %v1008_v1, %v998_v22  ;;  %v3017_v3 = vrot.slane %v2429_v29, %v2347_v48 }
 0x12f   : > { %v1204_v16 = vmul.f32 %v3015_v60, %v2433_v32  ;;  %v1205_v15 = vmul.f32 %v3016_v23, %v2433_v32  ;;  %v3018_v58 = vrot.slane %v2443_v37, %v2347_v48  ;;  %v555_v38 = vrot.slane %v2604_v56, %v2337_v42 }
 0x130   : > { %v1216_v52 = vmul.f32 %v3017_v3, %v2467_v34  ;;  %v567_v4 = vrot.slane %v2604_v56, %v2347_v48  ;;  %v3019_v20 = vrot.slane %v2390_v6, %v2339_v43  ;;  %v3020_v0 = vrot.slane %v2401_v11, %v2339_v43 }
 0x131   : > { %v1206_v54 = vadd.f32 %v1204_v16, %v2227_v17  ;;  %v1217_v33 = vmul.f32 %v3018_v58, %v2467_v34  ;;  %v2633_v1 = vadd.f32 %v1009_v45, %v999_v61  ;;  %v1130_v9 = vadd.f32 %v1128_v51, %v1118_v49 }
 0x132   : > { %v1140_v63 = vmul.f32 %v3019_v20, %v2481_v47  ;;  %v1141_v5 = vmul.f32 %v3020_v0, %v2481_v47  ;;  %v1131_v55 = vadd.f32 %v1129_v13, %v1119_v14  ;;  %v1207_v22 = vadd.f32 %v1205_v15, %v2227_v17 }
 0x133   : > { %v556_v8 = vmul.f32 %v555_v38, %v2606_v2  ;;  %v591_v60 = vrot.slane %v2604_v56, %v2339_v43  ;;  %v579_v16 = vrot.slane %v2604_v56, %v2335_v41  ;;  %v1218_v23 = vadd.f32 %v1216_v52, %v1206_v54  ;;  %v2654_v52 = vpop.permute.xlu0 %573 }
 0x134   : > { %v568_v3 = vmul.f32 %v567_v4, %v2631_v50  ;;  %v2642_v58 = vadd.f32 %v1140_v63, %v1130_v9  ;;  %v2644_v20 = vadd.f32 %v1141_v5, %v1131_v55  ;;  %v1219_v45 = vadd.f32 %v1217_v33, %v1207_v22 }
 0x135   : > { %v557_v51 = vadd.f32 %v556_v8, %v545_v26  ;;  %v558_v13 = vadd.f32 %v556_v8, %v546_v35  ;;  %v1230_v61 = vadd.f32 %v1228_v18, %v1218_v23  ;;  %v3021_v49 = vrot.slane %v2429_v29, %v2339_v43  ;;  %v2659_v18 = vpop.permute.xlu1 %585 }
 0x136   : > { %v1231_v15 = vadd.f32 %v1229_v27, %v1219_v45  ;;  %v1241_v54 = vmul.f32 %v1239_v59, %v2481_v47  ;;  %v580_v26 = vmul.f32 %v579_v16, %v2654_v52  ;;  %v635_v35 = vrot.slane %v2322_v28, %v2337_v42 }
 0x137   : > { %v1240_v14 = vmul.f32 %v3021_v49, %v2481_v47  ;;  %v569_v38 = vadd.f32 %v568_v3, %v557_v51  ;;  %v570_v4 = vadd.f32 %v568_v3, %v558_v13  ;;  %v592_v27 = vmul.f32 %v591_v60, %v2659_v18 }
 0x138   : > { %v2663_v33 = vadd.f32 %v1241_v54, %v1231_v15  ;;  %v639_v59 = vrot.slane %v2326_v31, %v2337_v42  ;;  %v647_v9 = vrot.slane %v2322_v28, %v2347_v48  ;;  %v651_v55 = vrot.slane %v2326_v31, %v2347_v48 }
 0x139   : > { %v2656_v63 = vadd.f32 %v1240_v14, %v1230_v61  ;;  %v581_v0 = vadd.f32 %v580_v26, %v569_v38  ;;  %v582_v5 = vadd.f32 %v580_v26, %v570_v4  ;;  %v640_v16 = vmul.f32 %v635_v35, %v2433_v32 }
 0x13a   : > { %v641_v23 = vmul.f32 %v639_v59, %v2433_v32  ;;  %v652_v60 = vmul.f32 %v647_v9, %v2467_v34  ;;  %v653_v3 = vmul.f32 %v651_v55, %v2467_v34  ;;  %v659_v51 = vrot.slane %v2322_v28, %v2335_v41 }
 0x13b   : > { %v593_v22 = vadd.f32 %v592_v27, %v581_v0  ;;  %v594_v8 = vadd.f32 %v592_v27, %v582_v5  ;;  %v642_v45 = vadd.f32 %v640_v16, %v2227_v17  ;;  %v663_v61 = vrot.slane %v2326_v31, %v2335_v41 }
 0x13c   : > { %v643_v13 = vadd.f32 %v641_v23, %v2227_v17  ;;  %v664_v15 = vmul.f32 %v659_v51, %v2431_v30  ;;  %v671_v54 = vrot.slane %v2322_v28, %v2339_v43  ;;  %v675_v4 = vrot.slane %v2326_v31, %v2339_v43 }
 0x13d   : > { %1693 = vtanh.f32 %v593_v22  ;;  %v654_v49 = vadd.f32 %v652_v60, %v642_v45  ;;  %v665_v38 = vmul.f32 %v663_v61, %v2431_v30  ;;  %v735_v22 = vrot.slane %v2330_v36, %v2337_v42 }
 0x13e   : > { %1695 = vtanh.f32 %v594_v8  ;;  %v655_v14 = vadd.f32 %v653_v3, %v643_v13  ;;  %v676_v0 = vmul.f32 %v671_v54, %v2481_v47  ;;  %v677_v55 = vmul.f32 %v675_v4, %v2481_v47 }
 0x13f   : > { %v666_v26 = vadd.f32 %v664_v15, %v654_v49 }
 0x140   : > { %v667_v27 = vadd.f32 %v665_v38, %v655_v14  ;;  %v747_v38 = vrot.slane %v2330_v36, %v2347_v48 }
 0x141   : > { %v678_v23 = vadd.f32 %v676_v0, %v666_v26 }
 0x142   : > { %v679_v45 = vadd.f32 %v677_v55, %v667_v27 }
 0x147   : > { %v1694_v35 = vpop.eup %1693 }
 0x148   : > { %v1696_v59 = vpop.eup %1695  ;;  %v683_v5 = vrot.slane %v1694_v35, %v2337_v42  ;;  %v695_v9 = vrot.slane %v1694_v35, %v2347_v48  ;;  %v707_v3 = vrot.slane %v1694_v35, %v2335_v41  ;;  %v719_v61 = vrot.slane %v1694_v35, %v2339_v43 }
 0x149   : > { %v687_v8 = vrot.slane %v1696_v59, %v2337_v42  ;;  %v699_v16 = vrot.slane %v1696_v59, %v2347_v48  ;;  %v711_v13 = vrot.slane %v1696_v59, %v2335_v41  ;;  %v607_v15 = vrot.slane %v1694_v35, 4 }
 0x14a   : > { %v688_v60 = vmul.f32 %v683_v5, %v2606_v2  ;;  %v700_v14 = vmul.f32 %v695_v9, %v2631_v50  ;;  %v608_v54 = vrot.slane %v1696_v59, 4  ;;  %v723_v27 = vrot.slane %v1696_v59, %v2339_v43 }
 0x14b   : > { %v689_v51 = vmul.f32 %v687_v8, %v2606_v2  ;;  %v701_v26 = vmul.f32 %v699_v16, %v2631_v50  ;;  %v712_v5 = vmul.f32 %v707_v3, %v2654_v52  ;;  %v612_v55 = vsel %vm611_vm3, %v2604_v56, %v607_v15 }
 0x14c   : > { %v690_v49 = vadd.f32 %v688_v60, %v678_v23  ;;  %v613_v8 = vsel %vm611_vm3, %v2604_v56, %v608_v54  ;;  %v713_v35 = vmul.f32 %v711_v13, %v2654_v52  ;;  %614 = vst [vmem:[%s2714_s26] sm:$0xff] %v612_v55  ;;  %v740_v59 = vmul.f32 %v735_v22, %v2433_v32 }
 0x14d   : > { %v691_v4 = vadd.f32 %v689_v51, %v679_v45  ;;  %615 = vst [vmem:[%s2714_s26 + $0x8] sm:$0xff] %v613_v8  ;;  %v724_v23 = vmul.f32 %v719_v61, %v2659_v18  ;;  %v725_v3 = vmul.f32 %v723_v27, %v2659_v18  ;;  %v752_v56 = vmul.f32 %v747_v38, %v2467_v34 }
 0x14e   : > { %v702_v0 = vadd.f32 %v700_v14, %v690_v49  ;;  %v742_v13 = vadd.f32 %v740_v59, %v2227_v17  ;;  %v759_v32 = vrot.slane %v2330_v36, %v2335_v41  ;;  %v618_v22 = vrot.slane %v2316_v21, 4 }
 0x14f   : > { %v703_v9 = vadd.f32 %v701_v26, %v691_v4  ;;  %v619_v61 = vrot.slane %v2319_v25, 4  ;;  %v850_v14 = vrot.slane %v2330_v36, 4  ;;  %v851_v15 = vrot.slane %v2333_v39, 4 }
 0x150   : > { %v714_v16 = vadd.f32 %v712_v5, %v702_v0  ;;  %v754_v49 = vadd.f32 %v752_v56, %v742_v13  ;;  %v1082_v34 = vrot.slane %v2358_v53, 4  ;;  %v1083_v17 = vrot.slane %v2365_v57, 4 }
 0x151   : > { %v715_v60 = vadd.f32 %v713_v35, %v703_v9  ;;  %v1296_v54 = vrot.slane %v2392_v7, 4  ;;  %v1297_v38 = vrot.slane %v2403_v12, 4  ;;  %v622_v4 = vsel %vm611_vm3, %v2244_v24, %v618_v22 }
 0x152   : > { %v726_v45 = vadd.f32 %v724_v23, %v714_v16  ;;  %v623_v21 = vsel %vm611_vm3, %v2244_v24, %v619_v61  ;;  %v854_v25 = vsel %vm611_vm3, %v2322_v28, %v850_v14  ;;  %v855_v26 = vsel %vm611_vm3, %v2326_v31, %v851_v15  ;;  %624 = vst [vmem:[%s329_s20] sm:$0xff] %v622_v4 }
 0x153   : > { %v727_v51 = vadd.f32 %v725_v3, %v715_v60  ;;  %v1086_v53 = vsel %vm611_vm3, %v2342_v44, %v1082_v34  ;;  %v1087_v57 = vsel %vm611_vm3, %v2345_v46, %v1083_v17  ;;  %v1300_v7 = vmul.f32 %v1296_v54, %v2429_v29  ;;  %625 = vst [vmem:[%s329_s20 + $0x8] sm:$0xff] %v623_v21 }
 0x154   : > { %1697 = vtanh.f32 %v726_v45  ;;  %v1301_v12 = vmul.f32 %v1297_v38, %v2443_v37  ;;  %v764_v27 = vmul.f32 %v759_v32, %v2431_v30  ;;  %v771_v24 = vrot.slane %v2330_v36, %v2339_v43  ;;  %856 = vst [vmem:[%s329_s20 + $0x10] sm:$0xff] %v854_v25  ;;  %857 = vst [vmem:[%s329_s20 + $0x18] sm:$0xff] %v855_v26 }
 0x155   : > { %1699 = vtanh.f32 %v727_v51  ;;  %v1314_v28 = vrot.slane %v2429_v29, 4  ;;  %v1315_v31 = vrot.slane %v2443_v37, 4  ;;  %v775_v44 = vrot.slane %v2333_v39, %v2339_v43  ;;  %1088 = vst [vmem:[%s329_s20 + $0x20] sm:$0xff] %v1086_v53  ;;  %1089 = vst [vmem:[%s329_s20 + $0x28] sm:$0xff] %v1087_v57 }
 0x156   : > { %v1322_v46 = vsel %vm611_vm3, %v1300_v7, 0.0  ;;  %v1323_v30 = vsel %vm611_vm3, %v1301_v12, 0.0  ;;  %v766_v0 = vadd.f32 %v764_v27, %v754_v49 }
 0x157   : > { %v1318_v36 = vsel %vm611_vm3, %v2390_v6, %v1314_v28  ;;  %v1319_v39 = vsel %vm611_vm3, %v2401_v11, %v1315_v31  ;;  %1324 = vst [vmem:[%s329_s20 + $0x40] sm:$0xff] %v1322_v46  ;;  %1325 = vst [vmem:[%s329_s20 + $0x48] sm:$0xff] %v1323_v30  ;;  %v776_v6 = vmul.f32 %v771_v24, %v2481_v47 }
 0x158   : > { %1320 = vst [vmem:[%s329_s20 + $0x30] sm:$0xff] %v1318_v36  ;;  %1321 = vst [vmem:[%s329_s20 + $0x38] sm:$0xff] %v1319_v39 }
 0x15e   : > { %v2769_v29 = vpop.eup %1697 }
 0x15f   : > { %v2773_v37 = vpop.eup %1699  ;;  %v783_v5 = vrot.slane %v2769_v29, %v2337_v42  ;;  %v795_v11 = vrot.slane %v2769_v29, %v2347_v48 }
 0x160   : > { %1820 = shalt.err (!%p1817_p4)
}
 0x161   : > { %s1821_s14 = scalar_lea.hbm %s2757_s18, 1280  ;;  %s1825_s9 = scalar_lea.hbm %s2976_s6, 2560 }
 0x162   : > { %p1822_p5 = scmp.ne.s32.totalorder %s2757_s18, %s1821_s14  ;;  %p1826_p8 = scmp.lt.u32.totalorder %s2757_s18, %s2976_s6 }
 0x163   : > { %p1827_p7 = scmp.lt.u32.totalorder %s1825_s9, %s1821_s14  ;;  %p1829_p0 = scmp.lt.u32.totalorder %s1821_s14, %s2757_s18 }
 0x164   : > { %p1823_p1 = pnand %p1822_p5, %p3023_p9 }
 0x165   : > { %p1828_p10 = por %p1827_p7, %p1826_p8 }
 0x166   : > { %p1824_p11 = pneg %p1823_p1 }
 0x167   : > { %p1830_p2 = por %p1829_p0, %p1828_p10 }
 0x169   : > { %p1831_p13 = pnand %p1830_p2, %p1824_p11 }
 0x16b   : > { %1834 = shalt.err (!%p1831_p13)
}
 0x16c   : > { %s1933_s15 = smov 256   ;;  %s1934_s27 = smov 512   ;;  %v777_v55 = vmul.f32 %v775_v44, %v2481_v47  ;;  %v787_v8 = vrot.slane %v2773_v37, %v2337_v42  ;;  %v799_v9 = vrot.slane %v2773_v37, %v2347_v48  ;;  %v778_v35 = vadd.f32 %v776_v6, %v766_v0 }
 0x16d   : > { %s1935_s20 = smov 16   ;;  %v788_v59 = vmul.f32 %v783_v5, %v2606_v2  ;;  %v807_v16 = vrot.slane %v2769_v29, %v2335_v41  ;;  %v811_v3 = vrot.slane %v2773_v37, %v2335_v41  ;;  %v800_v56 = vmul.f32 %v795_v11, %v2631_v50  ;;  %s2918_s2 = scalar_lea.hbm %s2975_s5, %s1571_s7 }
 0x16e   : > { %1593 = dma.vmem_to_hbm [thread:$0]  (%p3023_p9), %s2771_s0, 1280, %s2757_s18, %s1332_s1, %s1933_s15, %s1934_s27, %s1935_s20   ;;  %v779_v23 = vadd.f32 %v777_v55, %v2521_v10  ;;  %v789_v60 = vmul.f32 %v787_v8, %v2606_v2  ;;  %v819_v45 = vrot.slane %v2769_v29, %v2339_v43  ;;  %v801_v13 = vmul.f32 %v799_v9, %v2631_v50 }
 0x16f   : > { %v790_v47 = vadd.f32 %v788_v59, %v778_v35  ;;  %v823_v49 = vrot.slane %v2773_v37, %v2339_v43  ;;  %v812_v10 = vmul.f32 %v807_v16, %v2654_v52  ;;  %v813_v61 = vmul.f32 %v811_v3, %v2654_v52  ;;  %s1345_s18 = sshll.u32 %s2714_s26, 4  ;;  %s1327_s30 = scalar_lea.sflag [#allocation4], %s2170_s29  ;;  %s2920_s18 = int_to_ptr.vmem [resolvable:$true] %s1345_s18 }
 0x170   : > { %v791_v51 = vadd.f32 %v789_v60, %v779_v23  ;;  %v824_v15 = vmul.f32 %v819_v45, %v2659_v18  ;;  %s1835_s11 = scalar_lea.vmem %s2920_s18, 1024  ;;  %s1936_s25 = smov [#allocation13]  }
 0x171   : > { %v802_v32 = vadd.f32 %v800_v56, %v790_v47  ;;  %v825_v17 = vmul.f32 %v823_v49, %v2659_v18  ;;  %p1836_p3 = scmp.ne.s32.totalorder %s2920_s18, %s1835_s11  ;;  %s1839_s16 = sshll.u32 %s1936_s25, 4  ;;  %s1840_s16 = int_to_ptr.vmem [resolvable:$false] %s1839_s16 }
 0x172   : > { %v803_v22 = vadd.f32 %v801_v13, %v791_v51  ;;  %s1841_s7 = scalar_lea.vmem %s1840_s16, 2048  ;;  %p1842_p4 = scmp.lt.s32.totalorder %s2920_s18, %s1840_s16 }
 0x173   : > { %v814_v14 = vadd.f32 %v812_v10, %v802_v32  ;;  %p1837_p6 = pnand %p1836_p3, %p3023_p9  ;;  %p1843_p5 = scmp.lt.s32.totalorder %s1841_s7, %s1835_s11 }
 0x174   : > { %v815_v34 = vadd.f32 %v813_v61, %v803_v22 }
 0x175   : > { %v826_v54 = vadd.f32 %v824_v15, %v814_v14  ;;  %p1838_p12 = pneg %p1837_p6  ;;  %p1844_p1 = por %p1843_p5, %p1842_p4 }
 0x176   : > { %v827_v38 = vadd.f32 %v825_v17, %v815_v34 }
 0x177   : > { %1701 = vtanh.f32 %v826_v54  ;;  %p1845_p11 = pnand %p1844_p1, %p1838_p12 }
 0x178   : > { %1703 = vtanh.f32 %v827_v38 }
 0x181   : > { %v1702_v4 = vpop.eup %1701 }
 0x182   : > { %v1704_v21 = vpop.eup %1703  ;;  %v915_v25 = vrot.slane %v1702_v4, %v2337_v42  ;;  %v927_v26 = vrot.slane %v1702_v4, %v2347_v48  ;;  %v939_v12 = vrot.slane %v1702_v4, %v2335_v41  ;;  %v951_v28 = vrot.slane %v1702_v4, %v2339_v43 }
 0x183   : > { %v919_v53 = vrot.slane %v1704_v21, %v2337_v42  ;;  %v931_v57 = vrot.slane %v1704_v21, %v2347_v48  ;;  %v943_v24 = vrot.slane %v1704_v21, %v2335_v41  ;;  %v840_v46 = vrot.slane %v1702_v4, 4 }
 0x184   : > { %v920_v7 = vmul.f32 %v915_v25, %v2606_v2  ;;  %v932_v44 = vmul.f32 %v927_v26, %v2631_v50  ;;  %v841_v30 = vrot.slane %v1704_v21, 4  ;;  %v955_v39 = vrot.slane %v1704_v21, %v2339_v43 }
 0x185   : > { %v921_v27 = vmul.f32 %v919_v53, %v2606_v2  ;;  %v933_v36 = vmul.f32 %v931_v57, %v2631_v50  ;;  %v944_v5 = vmul.f32 %v939_v12, %v2654_v52  ;;  %v844_v11 = vsel %vm611_vm3, %v2769_v29, %v840_v46 }
 0x186   : > { %v922_v31 = vadd.f32 %v920_v7, %v2578_v19  ;;  %v845_v55 = vsel %vm611_vm3, %v2773_v37, %v841_v30  ;;  %v945_v8 = vmul.f32 %v943_v24, %v2654_v52  ;;  %846 = vst [vmem:[%s2714_s26 + $0x10] sm:$0xff] %v844_v11  ;;  %v957_v59 = vmul.f32 %v955_v39, %v2659_v18 }
 0x187   : > { %v923_v0 = vadd.f32 %v921_v27, %v2590_v40  ;;  %847 = vst [vmem:[%s2714_s26 + $0x18] sm:$0xff] %v845_v55  ;;  %v956_v40 = vmul.f32 %v951_v28, %v2659_v18 }
 0x188   : > { %v934_v6 = vadd.f32 %v932_v44, %v922_v31 }
 0x189   : > { %v935_v19 = vadd.f32 %v933_v36, %v923_v0 }
 0x18a   : > { %v946_v9 = vadd.f32 %v944_v5, %v934_v6 }
 0x18b   : > { %v947_v35 = vadd.f32 %v945_v8, %v935_v19 }
 0x18c   : > { %v958_v16 = vadd.f32 %v956_v40, %v946_v9 }
 0x18d   : > { %v959_v23 = vadd.f32 %v957_v59, %v947_v35 }
 0x18e   : > { %1705 = vtanh.f32 %v958_v16 }
 0x18f   : > { %1707 = vtanh.f32 %v959_v23 }
 0x198   : > { %v1706_v60 = vpop.eup %1705 }
 0x199   : > { %v1708_v29 = vpop.eup %1707  ;;  %v1015_v3 = vrot.slane %v1706_v60, %v2337_v42  ;;  %v1027_v37 = vrot.slane %v1706_v60, %v2347_v48  ;;  %v1039_v51 = vrot.slane %v1706_v60, %v2335_v41  ;;  %v1051_v22 = vrot.slane %v1706_v60, %v2339_v43 }
 0x19a   : > { %v1019_v47 = vrot.slane %v1708_v29, %v2337_v42  ;;  %v1031_v56 = vrot.slane %v1708_v29, %v2347_v48  ;;  %v1043_v49 = vrot.slane %v1708_v29, %v2335_v41  ;;  %v1055_v15 = vrot.slane %v1708_v29, %v2339_v43 }
 0x19b   : > { %v1020_v45 = vmul.f32 %v1015_v3, %v2606_v2  ;;  %v1032_v10 = vmul.f32 %v1027_v37, %v2631_v50  ;;  %v1044_v17 = vmul.f32 %v1039_v51, %v2654_v52  ;;  %v1056_v21 = vmul.f32 %v1051_v22, %v2659_v18 }
 0x19c   : > { %v1021_v13 = vmul.f32 %v1019_v47, %v2606_v2  ;;  %v1033_v14 = vmul.f32 %v1031_v56, %v2631_v50  ;;  %v1045_v38 = vmul.f32 %v1043_v49, %v2654_v52  ;;  %v1057_v25 = vmul.f32 %v1055_v15, %v2659_v18 }
 0x19d   : > { %v1022_v32 = vadd.f32 %v1020_v45, %v2608_v62 }
 0x19e   : > { %v1023_v61 = vadd.f32 %v1021_v13, %v2633_v1 }
 0x19f   : > { %v1034_v34 = vadd.f32 %v1032_v10, %v1022_v32 }
 0x1a0   : > { %v1035_v54 = vadd.f32 %v1033_v14, %v1023_v61 }
 0x1a1   : > { %v1046_v4 = vadd.f32 %v1044_v17, %v1034_v34 }
 0x1a2   : > { %v1047_v62 = vadd.f32 %v1045_v38, %v1035_v54 }
 0x1a3   : > { %v1058_v26 = vadd.f32 %v1056_v21, %v1046_v4 }
 0x1a4   : > { %v1059_v53 = vadd.f32 %v1057_v25, %v1047_v62 }
 0x1a5   : > { %1709 = vtanh.f32 %v1058_v26 }
 0x1a6   : > { %1711 = vtanh.f32 %v1059_v53 }
 0x1af   : > { %v1710_v1 = vpop.eup %1709 }
 0x1b0   : > { %v1712_v57 = vpop.eup %1711  ;;  %v1147_v7 = vrot.slane %v1710_v1, %v2337_v42  ;;  %v1159_v12 = vrot.slane %v1710_v1, %v2347_v48  ;;  %v1171_v31 = vrot.slane %v1710_v1, %v2335_v41  ;;  %v1183_v30 = vrot.slane %v1710_v1, %v2339_v43 }
 0x1b1   : > { %v1151_v27 = vrot.slane %v1712_v57, %v2337_v42  ;;  %v1163_v24 = vrot.slane %v1712_v57, %v2347_v48  ;;  %v1175_v46 = vrot.slane %v1712_v57, %v2335_v41  ;;  %v1072_v39 = vrot.slane %v1710_v1, 4 }
 0x1b2   : > { %v1152_v28 = vmul.f32 %v1147_v7, %v2606_v2  ;;  %v1164_v36 = vmul.f32 %v1159_v12, %v2631_v50  ;;  %v1073_v6 = vrot.slane %v1712_v57, 4  ;;  %v1187_v55 = vrot.slane %v1712_v57, %v2339_v43 }
 0x1b3   : > { %v1153_v44 = vmul.f32 %v1151_v27, %v2606_v2  ;;  %v1165_v11 = vmul.f32 %v1163_v24, %v2631_v50  ;;  %v1176_v8 = vmul.f32 %v1171_v31, %v2654_v52  ;;  %v1076_v9 = vsel %vm611_vm3, %v1706_v60, %v1072_v39 }
 0x1b4   : > { %v1154_v0 = vadd.f32 %v1152_v28, %v2642_v58  ;;  %v1077_v40 = vsel %vm611_vm3, %v1708_v29, %v1073_v6  ;;  %v1177_v58 = vmul.f32 %v1175_v46, %v2654_v52  ;;  %1078 = vst [vmem:[%s2714_s26 + $0x20] sm:$0xff] %v1076_v9  ;;  %v1188_v16 = vmul.f32 %v1183_v30, %v2659_v18 }
 0x1b5   : > { %v1155_v5 = vadd.f32 %v1153_v44, %v2644_v20  ;;  %1079 = vst [vmem:[%s2714_s26 + $0x28] sm:$0xff] %v1077_v40  ;;  %v1189_v23 = vmul.f32 %v1187_v55, %v2659_v18 }
 0x1b6   : > { %v1166_v19 = vadd.f32 %v1164_v36, %v1154_v0 }
 0x1b7   : > { %v1167_v35 = vadd.f32 %v1165_v11, %v1155_v5 }
 0x1b8   : > { %v1178_v59 = vadd.f32 %v1176_v8, %v1166_v19 }
 0x1b9   : > { %v1179_v20 = vadd.f32 %v1177_v58, %v1167_v35 }
 0x1ba   : > { %v1190_v3 = vadd.f32 %v1188_v16, %v1178_v59 }
 0x1bb   : > { %v1191_v37 = vadd.f32 %v1189_v23, %v1179_v20 }
 0x1bc   : > { %1713 = vtanh.f32 %v1190_v3 }
 0x1bd   : > { %1715 = vtanh.f32 %v1191_v37 }
 0x1c6   : > { %v1714_v47 = vpop.eup %1713 }
 0x1c7   : > { %v1716_v56 = vpop.eup %1715  ;;  %v1247_v60 = vrot.slane %v1714_v47, %v2337_v42  ;;  %v1259_v29 = vrot.slane %v1714_v47, %v2347_v48  ;;  %v1271_v49 = vrot.slane %v1714_v47, %v2335_v41  ;;  %v1283_v14 = vrot.slane %v1714_v47, %v2339_v43 }
 0x1c8   : > { %v1251_v45 = vrot.slane %v1716_v56, %v2337_v42  ;;  %v1263_v51 = vrot.slane %v1716_v56, %v2347_v48  ;;  %v1275_v10 = vrot.slane %v1716_v56, %v2335_v41  ;;  %v1287_v48 = vrot.slane %v1716_v56, %v2339_v43 }
 0x1c9   : > { %v1252_v13 = vmul.f32 %v1247_v60, %v2606_v2  ;;  %v1264_v61 = vmul.f32 %v1259_v29, %v2631_v50  ;;  %v1276_v17 = vmul.f32 %v1271_v49, %v2654_v52 }
 0x1ca   : > { %v1253_v32 = vmul.f32 %v1251_v45, %v2606_v2  ;;  %v1265_v42 = vmul.f32 %v1263_v51, %v2631_v50  ;;  %v1277_v41 = vmul.f32 %v1275_v10, %v2654_v52 }
 0x1cb   : > { %v1254_v22 = vadd.f32 %v1252_v13, %v2656_v63  ;;  %v1288_v63 = vmul.f32 %v1283_v14, %v2659_v18 }
 0x1cc   : > { %v1255_v15 = vadd.f32 %v1253_v32, %v2663_v33  ;;  %v1289_v33 = vmul.f32 %v1287_v48, %v2659_v18 }
 0x1cd   : > { %v1266_v34 = vadd.f32 %v1264_v61, %v1254_v22 }
 0x1ce   : > { %v1267_v54 = vadd.f32 %v1265_v42, %v1255_v15 }
 0x1cf   : > { %v1278_v2 = vadd.f32 %v1276_v17, %v1266_v34 }
 0x1d0   : > { %v1279_v38 = vadd.f32 %v1277_v41, %v1267_v54 }
 0x1d1   : > { %v1290_v4 = vadd.f32 %v1288_v63, %v1278_v2 }
 0x1d2   : > { %v1291_v50 = vadd.f32 %v1289_v33, %v1279_v38 }
 0x1d3   : > { %1717 = vtanh.f32 %v1290_v4 }
 0x1d4   : > { %1719 = vtanh.f32 %v1291_v50 }
 0x1dd   : > { %v1718_v43 = vpop.eup %1717 }
 0x1de   : > { %v1720_v21 = vpop.eup %1719  ;;  %v1304_v62 = vrot.slane %v1718_v43, 4 }
 0x1df   : > { %v1305_v25 = vrot.slane %v1720_v21, 4 }
 0x1e0   : > { %v1308_v52 = vsel %vm611_vm3, %v1714_v47, %v1304_v62 }
 0x1e1   : > { %v1309_v18 = vsel %vm611_vm3, %v1716_v56, %v1305_v25  ;;  %1310 = vst [vmem:[%s2714_s26 + $0x30] sm:$0xff] %v1308_v52 }
 0x1e2   : > { %1311 = vst [vmem:[%s2714_s26 + $0x38] sm:$0xff] %v1309_v18 }
 0x1e3   : > { %1848 = shalt.err (!%p1845_p11)
}
 0x1e4   : > { %s1849_s26 = scalar_lea.hbm %s2918_s2, 1024  ;;  %s1853_s19 = scalar_lea.hbm %s2975_s5, 2048 }
 0x1e5   : > { %p1850_p8 = scmp.ne.s32.totalorder %s2918_s2, %s1849_s26  ;;  %p1854_p0 = scmp.lt.u32.totalorder %s2918_s2, %s2975_s5 }
 0x1e6   : > { %p1855_p2 = scmp.lt.u32.totalorder %s1853_s19, %s1849_s26  ;;  %p1857_p3 = scmp.lt.u32.totalorder %s1849_s26, %s2918_s2 }
 0x1e7   : > { %p1851_p7 = pnand %p1850_p8, %p3023_p9 }
 0x1e8   : > { %p1856_p13 = por %p1855_p2, %p1854_p0 }
 0x1e9   : > { %p1852_p10 = pneg %p1851_p7 }
 0x1ea   : > { %p1858_p6 = por %p1857_p3, %p1856_p13 }
 0x1ec   : > { %p1859_p12 = pnand %p1858_p6, %p1852_p10 }
 0x1ee   : > { %1862 = shalt.err (!%p1859_p12)
}
 0x1ef   : > { %1592 = dma.vmem_to_hbm [thread:$0]  (%p3023_p9), %s2920_s18, 1024, %s2918_s2, %s1327_s30, %s1933_s15, %s1934_s27, %s1935_s20  }
 0x1f0 PF: > { %s1376_s10 = sand.u32 1, %s1909_s21   ;;  %p3024_p4 = scmp.ne.s32.totalorder %s2986_s28, 0 }
 0x1f1   : > { %p3025_p5 = scmp.ge.s32.totalorder %s1921_s24, 2  ;;  %s1377_s0 = scalar_lea.sflag [#allocation4], %s1376_s10 }
 0x1f3   : > { %p1614_p1 = pnand %p3025_p5, %p3024_p4 }
 0x1f5   : > { %1900 = dma.done.wait (!%p1614_p1), %s1377_s0, 1024  }
 0x1f6   : > { %1902 = vsyncadd (!%p1614_p1), %s1377_s0, 4294966272  ;;  %s1386_s12 = scalar_lea.sflag [#allocation15], %s1376_s10 }
 0x1f7   : > { %1904 = dma.done.wait (!%p1614_p1), %s1386_s12, 1280  }
 0x1f8   : > { %1906 = vsyncadd (!%p1614_p1), %s1386_s12, 4294966016  ;;  %p27_p9 = scmp.ge.s32.totalorder %s2092_s8, 4   ;;  %s3026_s21 = smov %s1913_s22 }
 0x1f9   : > { %s3027_s22 = smov %s1917_s23  ;;  %s3028_s23 = smov %s2108_s13 }
 0x1fa   : > { %s3029_s24 = smov %s2092_s8  ;;  %29 = sbr.rel (!%p27_p9) target bundleno = 16 (0x10), region = 120 }
 0x201   :  { %1391 = vsyncpa [#allocation3], 1 }
 0x202   :  { %1393 = vsyncpa [#allocation3 + $0x1], 1 }
 0x203   :  { %1394 = vsyncpa [#allocation4], 1 }
 0x204   :  { %1396 = vsyncpa [#allocation4 + $0x1], 1 }
 0x205   :  { %1397 = vsyncpa [#allocation15], 1 }
 0x206   :  { %1399 = vsyncpa [#allocation15 + $0x1], 1 }
 0x207   :  { %1400 = vsyncpa [#allocation5], 1 }
 0x208   :  { %1402 = vsyncpa [#allocation5 + $0x1], 1 }
 0x209   :  { %1403 = vsyncpa [#allocation8], 1 }
 0x20a   :  { %1404 = vsyncpa [#allocation6], 1 }
 0x20b   :  { %1406 = vsyncpa [#allocation6 + $0x1], 1 }
 0x20c   :  { %1407 = vsyncpa [#allocation11], 1 }

</bundles_post_ra>
